<compile_context>
chip_gen: v6e
topology: v6e:2x2x1
jax: 0.10.0
libtpu: 0.0.40
codegen_flags: <defaults>
</compile_context>

<pallas_src>
import math
import jax
import jax.numpy as jnp
from jax.experimental import pallas as pl
from jax.experimental.pallas import tpu as pltpu

# Large-but-safe additive mask value (stacking causal + padding masks cannot overflow; exp()
# still underflows to exactly 0).
NEG = -1e9
VMEM_LIMIT = 48 * 1024 * 1024  # portable across v5e/v6e/v7x


# ----------------------------- shared in-kernel helpers -----------------------------

def _rms(x, ln_w):
    # T5LayerNorm = RMSNorm (no mean subtraction, no bias), kept in f32.
    var = jnp.mean(x * x, axis=-1, keepdims=True)
    return x * jax.lax.rsqrt(var + 1e-6) * ln_w


def _bf16(x):
    return x.astype(jnp.bfloat16)


# ----------------------------- fused attention block -----------------------------
# RMSNorm(q) [-> RMSNorm(kv) for self-attn] -> fused Q / fused KV projections -> all-heads
# attention with additive bias+mask -> single output projection -> residual add.
# Grid: (batch, q-tiles), both "parallel".

def _make_attn_kernel(tq, Sk, D, H, Dk, cross):
    HDk = H * Dk

    def body(x, kvx, ln, wq, wkv, wo, bias, mask, o_ref):
        q_in = _rms(x, ln)                                   # [tq, D]
        kv_in = kvx if cross else _rms(kvx, ln)              # [Sk, D]
        q = jnp.dot(_bf16(q_in), _bf16(wq),
                    preferred_element_type=jnp.float32)      # [tq, HDk]
        kv = jnp.dot(_bf16(kv_in), _bf16(wkv),
                     preferred_element_type=jnp.float32)     # [Sk, 2*HDk]
        k = kv[:, :HDk]
        v = kv[:, HDk:]
        qh = jnp.transpose(q.reshape(tq, H, Dk), (1, 0, 2))  # [H, tq, Dk]
        kh = jnp.transpose(k.reshape(Sk, H, Dk), (1, 0, 2))  # [H, Sk, Dk]
        vh = jnp.transpose(v.reshape(Sk, H, Dk), (1, 0, 2))  # [H, Sk, Dk]
        # T5: no 1/sqrt(d) scaling; additive relative-position bias + padding mask.
        s = jnp.einsum('hqd,hkd->hqk', _bf16(qh), _bf16(kh),
                       preferred_element_type=jnp.float32)   # [H, tq, Sk]
        if bias is not None:
            s = s + bias                                     # [H, tq, Sk]
        s = s + (1.0 - mask) * NEG                           # mask: [1, 1, Sk]
        s = s - jnp.max(s, axis=-1, keepdims=True)
        p = jnp.exp(s)
        p = p / jnp.sum(p, axis=-1, keepdims=True)           # exact softmax (f32)
        ctx = jnp.einsum('hqk,hkd->hqd', _bf16(p), _bf16(vh),
                         preferred_element_type=jnp.float32)  # [H, tq, Dk]
        ctx2 = jnp.transpose(ctx, (1, 0, 2)).reshape(tq, HDk)
        out = x + jnp.dot(_bf16(ctx2), _bf16(wo),
                          preferred_element_type=jnp.float32)  # single output proj + residual
        o_ref[0] = out

    if cross:
        def kernel(hq_ref, kv_ref, ln_ref, wq_ref, wkv_ref, wo_ref, mask_ref, o_ref):
            body(hq_ref[0], kv_ref[0], ln_ref[...], wq_ref[...], wkv_ref[...], wo_ref[...],
                 None, mask_ref[...], o_ref)
    else:
        def kernel(hq_ref, kv_ref, ln_ref, wq_ref, wkv_ref, wo_ref, bias_ref, mask_ref, o_ref):
            body(hq_ref[0], kv_ref[0], ln_ref[...], wq_ref[...], wkv_ref[...], wo_ref[...],
                 bias_ref[0], mask_ref[...], o_ref)
    return kernel


def _q_tile(Sq):
    return 128 if Sq % 128 == 0 else Sq


def fused_self_attention_block(hidden, ln_w, p, bias, mask3):
    """hidden [B,Sq,D], bias [1,H,Sq,Sq] (shared across batch), mask3 [B,1,Sq]."""
    B, Sq, D = hidden.shape
    Sk = Sq
    H = bias.shape[1]
    HDk = p["q"].shape[1]
    tq = _q_tile(Sq)
    kernel = _make_attn_kernel(tq, Sk, D, H, HDk // H, cross=False)
    return pl.pallas_call(
        kernel,
        out_shape=jax.ShapeDtypeStruct((B, Sq, D), jnp.float32),
        grid=(B, Sq // tq),
        in_specs=[pl.BlockSpec((1, tq, D), lambda b, qi: (b, qi, 0)),     # q rows
                  pl.BlockSpec((1, Sk, D), lambda b, qi: (b, 0, 0)),      # kv rows (full seq)
                  pl.BlockSpec((1, D), lambda b, qi: (0, 0)),             # ln weight (resident)
                  pl.BlockSpec((D, HDk), lambda b, qi: (0, 0)),           # wq
                  pl.BlockSpec((D, 2 * HDk), lambda b, qi: (0, 0)),       # fused wkv
                  pl.BlockSpec((HDk, D), lambda b, qi: (0, 0)),           # wo
                  pl.BlockSpec((1, H, tq, Sk), lambda b, qi: (0, 0, qi, 0)),  # bias per q-tile
                  pl.BlockSpec((1, 1, Sk), lambda b, qi: (b, 0, 0))],     # padding mask
        out_specs=pl.BlockSpec((1, tq, D), lambda b, qi: (b, qi, 0)),
        compiler_params=pltpu.CompilerParams(
            dimension_semantics=("parallel", "parallel"),
            vmem_limit_bytes=VMEM_LIMIT),
    )(hidden, hidden, ln_w, p["q"], p["kv"], p["o"], bias, mask3)


def fused_cross_attention_block(hidden, kv_hidden, ln_w, p, num_heads, mask3):
    """hidden [B,Sq,D] (decoder), kv_hidden [B,Sk,D] (encoder output), mask3 [B,1,Sk].
    No relative-position bias in T5 cross-attention -> no bias ref at all."""
    B, Sq, D = hidden.shape
    Sk = kv_hidden.shape[1]
    H = num_heads
    HDk = p["q"].shape[1]
    tq = _q_tile(Sq)
    kernel = _make_attn_kernel(tq, Sk, D, H, HDk // H, cross=True)
    return pl.pallas_call(
        kernel,
        out_shape=jax.ShapeDtypeStruct((B, Sq, D), jnp.float32),
        grid=(B, Sq // tq),
        in_specs=[pl.BlockSpec((1, tq, D), lambda b, qi: (b, qi, 0)),
                  pl.BlockSpec((1, Sk, D), lambda b, qi: (b, 0, 0)),
                  pl.BlockSpec((1, D), lambda b, qi: (0, 0)),
                  pl.BlockSpec((D, HDk), lambda b, qi: (0, 0)),
                  pl.BlockSpec((D, 2 * HDk), lambda b, qi: (0, 0)),
                  pl.BlockSpec((HDk, D), lambda b, qi: (0, 0)),
                  pl.BlockSpec((1, 1, Sk), lambda b, qi: (b, 0, 0))],
        out_specs=pl.BlockSpec((1, tq, D), lambda b, qi: (b, qi, 0)),
        compiler_params=pltpu.CompilerParams(
            dimension_semantics=("parallel", "parallel"),
            vmem_limit_bytes=VMEM_LIMIT),
    )(hidden, kv_hidden, ln_w, p["q"], p["kv"], p["o"], mask3)


# ----------------------------- fused RMSNorm + FFN + residual (+ optional final LN) -----------

def _make_ffn_kernel(apply_final_ln):
    def ffn_body(x_ref, ln_ref, wi_ref, wo_ref, o_ref, acc_ref, fln_ref):
        j = pl.program_id(1)

        @pl.when(j == 0)
        def _():
            acc_ref[...] = jnp.zeros_like(acc_ref)

        x = x_ref[...]
        normed = _rms(x, ln_ref[...])
        h = jnp.maximum(jnp.dot(_bf16(normed), _bf16(wi_ref[...]),
                                preferred_element_type=jnp.float32), 0.0)   # ReLU
        acc_ref[...] += jnp.dot(_bf16(h), _bf16(wo_ref[...]),
                                preferred_element_type=jnp.float32)

        @pl.when(j == pl.num_programs(1) - 1)
        def _():
            out = acc_ref[...] + x                                           # residual
            if fln_ref is not None:
                out = _rms(out, fln_ref[...])                                # fused final LN
            o_ref[...] = out

    if apply_final_ln:
        def kernel(x_ref, ln_ref, wi_ref, wo_ref, fln_ref, o_ref, acc_ref):
            ffn_body(x_ref, ln_ref, wi_ref, wo_ref, o_ref, acc_ref, fln_ref)
    else:
        def kernel(x_ref, ln_ref, wi_ref, wo_ref, o_ref, acc_ref):
            ffn_body(x_ref, ln_ref, wi_ref, wo_ref, o_ref, acc_ref, None)
    return kernel


def fused_ffn_block(hidden, ln_w, wi, wo, final_ln=None, block_m=256, block_ff=512):
    B, S, D = hidden.shape
    x = hidden.reshape(-1, D)
    M = x.shape[0]
    Dff = wi.shape[1]
    bm = block_m if M % block_m == 0 else M
    bff = block_ff if Dff % block_ff == 0 else Dff
    kernel = _make_ffn_kernel(final_ln is not None)

    in_specs = [pl.BlockSpec((bm, D), lambda i, j: (i, 0)),
                pl.BlockSpec((1, D), lambda i, j: (0, 0)),
                pl.BlockSpec((D, bff), lambda i, j: (0, j)),
                pl.BlockSpec((bff, D), lambda i, j: (j, 0))]
    args = [x, ln_w, wi, wo]
    if final_ln is not None:
        in_specs.append(pl.BlockSpec((1, D), lambda i, j: (0, 0)))
        args.append(final_ln)

    out = pl.pallas_call(
        kernel,
        out_shape=jax.ShapeDtypeStruct((M, D), jnp.float32),
        grid=(M // bm, Dff // bff),
        in_specs=in_specs,
        out_specs=pl.BlockSpec((bm, D), lambda i, j: (i, 0)),
        scratch_shapes=[pltpu.VMEM((bm, D), jnp.float32)],
        compiler_params=pltpu.CompilerParams(
            dimension_semantics=("parallel", "arbitrary"),
            vmem_limit_bytes=VMEM_LIMIT),
    )(*args)
    return out.reshape(B, S, D)


# ----------------------------- fused final LN + lm_head + online LSE -----------------------------

def _make_lmhead_kernel(scale):
    def kernel(h_ref, ln_ref, emb_ref, logits_ref, lse_ref, m_sc, l_sc):
        j = pl.program_id(1)

        @pl.when(j == 0)
        def _():
            m_sc[...] = jnp.full_like(m_sc[...], -jnp.inf)
            l_sc[...] = jnp.zeros_like(l_sc[...])

        # decoder final RMSNorm + tied-embedding d_model**-0.5 rescale folded in-kernel
        x = _rms(h_ref[...], ln_ref[...]) * scale
        # contract on D directly against the [bv, D] embedding chunk (no transposed copy)
        logits = jax.lax.dot_general(_bf16(x), _bf16(emb_ref[...]),
                                     (((1,), (1,)), ((), ())),
                                     preferred_element_type=jnp.float32)     # [bm, bv]
        logits_ref[...] = logits

        # online log-sum-exp across vocab chunks (f32)
        m_new = jnp.maximum(m_sc[...], jnp.max(logits, axis=-1, keepdims=True))
        l_sc[...] = l_sc[...] * jnp.exp(m_sc[...] - m_new) + \
            jnp.sum(jnp.exp(logits - m_new), axis=-1, keepdims=True)
        m_sc[...] = m_new

        @pl.when(j == pl.num_programs(1) - 1)
        def _():
            lse_ref[...] = m_sc[...] + jnp.log(l_sc[...])
    return kernel


def fused_lmhead_lse(dec_hidden2d, final_ln, emb, block_m=256, block_v=512):
    M, D = dec_hidden2d.shape
    V = emb.shape[0]
    bm = block_m if M % block_m == 0 else M
    bv = block_v if V % block_v == 0 else V
    kernel = _make_lmhead_kernel(D ** -0.5)
    return pl.pallas_call(
        kernel,
        out_shape=(jax.ShapeDtypeStruct((M, V), jnp.float32),
                   jax.ShapeDtypeStruct((M, 1), jnp.float32)),
        grid=(M // bm, V // bv),
        in_specs=[pl.BlockSpec((bm, D), lambda i, j: (i, 0)),
                  pl.BlockSpec((1, D), lambda i, j: (0, 0)),
                  pl.BlockSpec((bv, D), lambda i, j: (j, 0))],   # embedding streamed in V-chunks
        out_specs=(pl.BlockSpec((bm, bv), lambda i, j: (i, j)),
                   pl.BlockSpec((bm, 1), lambda i, j: (i, 0))),
        scratch_shapes=[pltpu.VMEM((bm, 1), jnp.float32),
                        pltpu.VMEM((bm, 1), jnp.float32)],
        compiler_params=pltpu.CompilerParams(
            dimension_semantics=("parallel", "arbitrary"),
            vmem_limit_bytes=VMEM_LIMIT),
    )(dec_hidden2d, final_ln, emb)


# ----------------------------- T5 glue (plain JAX) -----------------------------

def relative_position_bucket(relative_position, bidirectional, num_buckets, max_distance):
    relative_buckets = jnp.zeros_like(relative_position)
    if bidirectional:
        num_buckets //= 2
        relative_buckets = relative_buckets + (relative_position > 0).astype(jnp.int32) * num_buckets
        relative_position = jnp.abs(relative_position)
    else:
        relative_position = -jnp.minimum(relative_position, 0)
    max_exact = num_buckets // 2
    is_small = relative_position < max_exact
    rp = jnp.maximum(relative_position, 1).astype(jnp.float32)
    rel_if_large = max_exact + (
        jnp.log(rp / max_exact) / math.log(max_distance / max_exact) * (num_buckets - max_exact)
    ).astype(jnp.int32)
    rel_if_large = jnp.minimum(rel_if_large, num_buckets - 1)
    return relative_buckets + jnp.where(is_small, relative_position, rel_if_large)


def compute_bias(table, q_len, k_len, bidirectional, num_buckets, max_distance):
    ctx = jnp.arange(q_len)[:, None]
    mem = jnp.arange(k_len)[None, :]
    buckets = relative_position_bucket(mem - ctx, bidirectional, num_buckets, max_distance)
    values = table[buckets]                        # [q, k, H]
    return jnp.transpose(values, (2, 0, 1))[None]  # [1, H, q, k]  (shared across batch)


def encoder_forward(params, cfg, input_ids, attention_mask):
    S = input_ids.shape[1]
    hidden = params["shared"][input_ids]
    pos_bias = compute_bias(params["encoder"]["layers"][0]["rel_bias"], S, S, True,
                            cfg["num_buckets"], cfg["max_distance"])            # [1,H,S,S]
    mask3 = attention_mask.astype(jnp.float32)[:, None, :]                      # [B,1,S]
    layers = params["encoder"]["layers"]
    for idx, layer in enumerate(layers):
        hidden = fused_self_attention_block(hidden, layer["ln0"], layer["attn"], pos_bias, mask3)
        final_ln = params["encoder"]["final_ln"] if idx == len(layers) - 1 else None
        hidden = fused_ffn_block(hidden, layer["ln1"], layer["wi"], layer["wo"],
                                 final_ln=final_ln)   # encoder final LN fused into last FFN
    return hidden


def decoder_forward(params, cfg, decoder_input_ids, decoder_attention_mask,
                    encoder_hidden, encoder_attention_mask):
    St = decoder_input_ids.shape[1]
    H = cfg["num_heads"]
    hidden = params["shared"][decoder_input_ids]

    seq_ids = jnp.arange(St)
    causal = (seq_ids[None, :] <= seq_ids[:, None]).astype(jnp.float32)          # [St,St]
    self_bias = compute_bias(params["decoder"]["layers"][0]["rel_bias"], St, St, False,
                             cfg["num_buckets"], cfg["max_distance"])
    self_bias = self_bias + (1.0 - causal)[None, None] * NEG                     # [1,H,St,St]
    self_mask3 = decoder_attention_mask.astype(jnp.float32)[:, None, :]          # [B,1,St]
    cross_mask3 = encoder_attention_mask.astype(jnp.float32)[:, None, :]         # [B,1,Ss]

    for layer in params["decoder"]["layers"]:
        hidden = fused_self_attention_block(hidden, layer["ln0"], layer["self_attn"],
                                            self_bias, self_mask3)
        hidden = fused_cross_attention_block(hidden, encoder_hidden, layer["ln1"],
                                             layer["cross_attn"], H, cross_mask3)
        hidden = fused_ffn_block(hidden, layer["ln2"], layer["wi"], layer["wo"])
    return hidden   # decoder final layer norm is fused into the lm_head kernel


def shift_right(labels, decoder_start_token_id=0, pad_token_id=0):
    shifted = jnp.zeros_like(labels)
    shifted = shifted.at[:, 1:].set(labels[:, :-1])
    shifted = shifted.at[:, 0].set(decoder_start_token_id)
    return jnp.where(shifted == -100, pad_token_id, shifted)


def qa_model_forward(params, cfg, input_ids, attention_mask, labels, decoder_attention_mask):
    """Mirrors T5ForConditionalGeneration.forward(...); returns (loss, lm_logits)."""
    B = input_ids.shape[0]
    D, V = cfg["d_model"], cfg["vocab"]
    enc_hidden = encoder_forward(params, cfg, input_ids, attention_mask)
    decoder_input_ids = shift_right(labels)
    dec_hidden = decoder_forward(params, cfg, decoder_input_ids, decoder_attention_mask,
                                 enc_hidden, attention_mask)
    St = dec_hidden.shape[1]

    logits2d, lse = fused_lmhead_lse(dec_hidden.reshape(-1, D),
                                     params["decoder"]["final_ln"], params["shared"])
    logits = logits2d.reshape(B, St, V)

    # picked-logit gather + masked mean over valid tokens: tiny [M]-sized work, plain JAX
    labels_flat = labels.reshape(-1)
    valid = (labels_flat != -100)
    safe_labels = jnp.where(valid, labels_flat, 0).astype(jnp.int32)
    picked = jnp.take_along_axis(logits2d, safe_labels[:, None], axis=1)[:, 0]
    nll = (lse[:, 0] - picked) * valid.astype(jnp.float32)
    loss = jnp.sum(nll) / jnp.sum(valid.astype(jnp.float32))
    return loss, logits


# ----------------------------- deterministic init -----------------------------

def init_params(key, cfg):
    D, V, H, Dkv = cfg["d_model"], cfg["vocab"], cfg["num_heads"], cfg["d_kv"]
    Dff, L, NB = cfg["d_ff"], cfg["n_layers"], cfg["num_buckets"]
    inner = H * Dkv
    keys = iter(jax.random.split(key, 64))

    def nrm(shape, scale=0.05):
        return scale * jax.random.normal(next(keys), shape, dtype=jnp.float32)

    def attn():
        # k and v projection weights are pre-fused into one [D, 2*inner] matrix
        return dict(q=nrm((D, inner)), kv=nrm((D, 2 * inner)), o=nrm((inner, D)))

    def enc_layer(has_bias):
        p = dict(ln0=jnp.ones((1, D), jnp.float32), attn=attn(),
                 ln1=jnp.ones((1, D), jnp.float32), wi=nrm((D, Dff)), wo=nrm((Dff, D)))
        if has_bias:
            p["rel_bias"] = nrm((NB, H))
        return p

    def dec_layer(has_bias):
        p = dict(ln0=jnp.ones((1, D), jnp.float32), self_attn=attn(),
                 ln1=jnp.ones((1, D), jnp.float32), cross_attn=attn(),
                 ln2=jnp.ones((1, D), jnp.float32), wi=nrm((D, Dff)), wo=nrm((Dff, D)))
        if has_bias:
            p["rel_bias"] = nrm((NB, H))
        return p

    return dict(
        shared=nrm((V, D), scale=1.0),
        encoder=dict(layers=[enc_layer(i == 0) for i in range(L)],
                     final_ln=jnp.ones((1, D), jnp.float32)),
        decoder=dict(layers=[dec_layer(i == 0) for i in range(L)],
                     final_ln=jnp.ones((1, D), jnp.float32)),
    )


if __name__ == "__main__":
    cfg = dict(vocab=128, d_model=32, num_heads=4, d_kv=8, d_ff=64,
               n_layers=2, num_buckets=32, max_distance=128)
    key = jax.random.PRNGKey(0)
    pkey, ikey, lkey = jax.random.split(key, 3)
    params = init_params(pkey, cfg)

    B, S_src, S_tgt = 2, 8, 8
    input_ids = jax.random.randint(ikey, (B, S_src), 0, cfg["vocab"], dtype=jnp.int32)
    labels = jax.random.randint(lkey, (B, S_tgt), 0, cfg["vocab"], dtype=jnp.int32)
    labels = labels.at[1, -1].set(-100)  # exercise ignore_index
    attention_mask = jnp.ones((B, S_src), dtype=jnp.int32)
    decoder_attention_mask = jnp.ones((B, S_tgt), dtype=jnp.int32)

    fwd = jax.jit(lambda p, *a: qa_model_forward(p, cfg, *a))
    loss, logits = fwd(params, input_ids, attention_mask, labels, decoder_attention_mask)
    jax.block_until_ready((loss, logits))
    assert logits.shape == (B, S_tgt, cfg["vocab"])
    assert bool(jnp.isfinite(loss))
    print("KERNEL_OK")
</pallas_src>

<mosaic_0001>
module attributes {stable_mosaic.version = 11 : i64} {
  func.func @kernel(%arg0: i32, %arg1: i32, %arg2: memref<16x32xf32, #tpu.memory_space<vmem>>, %arg3: memref<1x32xf32, #tpu.memory_space<vmem>>, %arg4: memref<32x64xf32, #tpu.memory_space<vmem>>, %arg5: memref<64x32xf32, #tpu.memory_space<vmem>>, %arg6: memref<1x32xf32, #tpu.memory_space<vmem>>, %arg7: memref<16x32xf32, #tpu.memory_space<vmem>>, %arg8: memref<16x32xf32, #tpu.memory_space<vmem>>) attributes {dimension_semantics = [#tpu.dimension_semantics<parallel>, #tpu.dimension_semantics<arbitrary>], iteration_bounds = array<i64: 1, 1>, scalar_prefetch = 0 : i64, scratch_operands = 1 : i64, tpu.core_type = #tpu.core_type<tc>, window_params = [{transform_indices = @transform_0, window_bounds = array<i64: 16, 32>}, {pipeline_mode = #tpu.pipeline_mode<synchronous>, transform_indices = @transform_1, window_bounds = array<i64: 1, 32>}, {transform_indices = @transform_2, window_bounds = array<i64: 32, 64>}, {transform_indices = @transform_3, window_bounds = array<i64: 64, 32>}, {pipeline_mode = #tpu.pipeline_mode<synchronous>, transform_indices = @transform_4, window_bounds = array<i64: 1, 32>}, {transform_indices = @transform_5, window_bounds = array<i64: 16, 32>}]} {
    %c0_i32 = arith.constant 0 : i32
    %0 = arith.cmpi eq, %arg1, %c0_i32 : i32
    %1 = arith.extui %0 : i1 to i32
    %c0_i32_0 = arith.constant 0 : i32
    %2 = arith.cmpi ne, %1, %c0_i32_0 : i32
    scf.if %2 {
      %cst_19 = arith.constant 0.000000e+00 : f32
      %33 = vector.broadcast %cst_19 : f32 to vector<16x32xf32>
      %c0_20 = arith.constant 0 : index
      %c0_21 = arith.constant 0 : index
      %34 = vector.load %arg8[%c0_20, %c0_21] : memref<16x32xf32, #tpu.memory_space<vmem>>, vector<16x32xf32>
      tpu.vector_store %arg8[%c0_20, %c0_21], %33 {strides = array<i32>} : memref<16x32xf32, #tpu.memory_space<vmem>>, vector<16x32xf32>,
    } else {
    }
    %c0 = arith.constant 0 : index
    %c0_1 = arith.constant 0 : index
    %3 = vector.load %arg2[%c0, %c0_1] : memref<16x32xf32, #tpu.memory_space<vmem>>, vector<16x32xf32>
    %c0_2 = arith.constant 0 : index
    %c0_3 = arith.constant 0 : index
    %4 = vector.load %arg3[%c0_2, %c0_3] : memref<1x32xf32, #tpu.memory_space<vmem>>, vector<1x32xf32>
    %5 = arith.mulf %3, %3 : vector<16x32xf32>
    %cst = arith.constant dense<0.000000e+00> : vector<16xf32>
    %6 = vector.multi_reduction <add>, %5, %cst [1] : vector<16x32xf32> to vector<16xf32>
    %7 = vector.shape_cast %6 : vector<16xf32> to vector<16x1xf32>
    %cst_4 = arith.constant 3.200000e+01 : f32
    %8 = vector.broadcast %cst_4 : f32 to vector<16x1xf32>
    %9 = arith.divf %7, %8 : vector<16x1xf32>
    %cst_5 = arith.constant 9.99999997E-7 : f32
    %10 = vector.broadcast %cst_5 : f32 to vector<16x1xf32>
    %11 = arith.addf %9, %10 : vector<16x1xf32>
    %12 = math.rsqrt %11 : vector<16x1xf32>
    %13 = vector.broadcast %12 : vector<16x1xf32> to vector<16x32xf32>
    %14 = arith.mulf %3, %13 : vector<16x32xf32>
    %15 = vector.broadcast %4 : vector<1x32xf32> to vector<16x32xf32>
    %16 = arith.mulf %14, %15 : vector<16x32xf32>
    %17 = arith.truncf %16 : vector<16x32xf32> to vector<16x32xbf16>
    %c0_6 = arith.constant 0 : index
    %c0_7 = arith.constant 0 : index
    %18 = vector.load %arg4[%c0_6, %c0_7] : memref<32x64xf32, #tpu.memory_space<vmem>>, vector<32x64xf32>
    %19 = arith.truncf %18 : vector<32x64xf32> to vector<32x64xbf16>
    %cst_8 = arith.constant dense<0.000000e+00> : vector<16x64xf32>
    %20 = tpu.matmul %17, %19, %cst_8 {dimension_numbers = #tpu.dot_dimension_numbers<[1], [0], [0], [1], [0, 0, 1, 1], [], []>} : vector<16x32xbf16>, vector<32x64xbf16>, vector<16x64xf32> -> vector<16x64xf32>
    %cst_9 = arith.constant 0.000000e+00 : f32
    %21 = vector.broadcast %cst_9 : f32 to vector<16x64xf32>
    %22 = arith.maximumf %20, %21 : vector<16x64xf32>
    %c0_10 = arith.constant 0 : index
    %c0_11 = arith.constant 0 : index
    %23 = vector.load %arg8[%c0_10, %c0_11] : memref<16x32xf32, #tpu.memory_space<vmem>>, vector<16x32xf32>
    %24 = arith.truncf %22 : vector<16x64xf32> to vector<16x64xbf16>
    %c0_12 = arith.constant 0 : index
    %c0_13 = arith.constant 0 : index
    %25 = vector.load %arg5[%c0_12, %c0_13] : memref<64x32xf32, #tpu.memory_space<vmem>>, vector<64x32xf32>
    %26 = arith.truncf %25 : vector<64x32xf32> to vector<64x32xbf16>
    %cst_14 = arith.constant dense<0.000000e+00> : vector<16x32xf32>
    %27 = tpu.matmul %24, %26, %cst_14 {dimension_numbers = #tpu.dot_dimension_numbers<[1], [0], [0], [1], [0, 0, 1, 1], [], []>} : vector<16x64xbf16>, vector<64x32xbf16>, vector<16x32xf32> -> vector<16x32xf32>
    %28 = arith.addf %23, %27 : vector<16x32xf32>
    %c0_15 = arith.constant 0 : index
    %c0_16 = arith.constant 0 : index
    %29 = vector.load %arg8[%c0_15, %c0_16] : memref<16x32xf32, #tpu.memory_space<vmem>>, vector<16x32xf32>
    tpu.vector_store %arg8[%c0_15, %c0_16], %28 {strides = array<i32>} : memref<16x32xf32, #tpu.memory_space<vmem>>, vector<16x32xf32>,
    %c0_i32_17 = arith.constant 0 : i32
    %30 = arith.cmpi eq, %arg1, %c0_i32_17 : i32
    %31 = arith.extui %30 : i1 to i32
    %c0_i32_18 = arith.constant 0 : i32
    %32 = arith.cmpi ne, %31, %c0_i32_18 : i32
    scf.if %32 {
      %c0_19 = arith.constant 0 : index
      %c0_20 = arith.constant 0 : index
      %33 = vector.load %arg8[%c0_19, %c0_20] : memref<16x32xf32, #tpu.memory_space<vmem>>, vector<16x32xf32>
      %34 = arith.addf %33, %3 : vector<16x32xf32>
      %c0_21 = arith.constant 0 : index
      %c0_22 = arith.constant 0 : index
      %35 = vector.load %arg6[%c0_21, %c0_22] : memref<1x32xf32, #tpu.memory_space<vmem>>, vector<1x32xf32>
      %36 = arith.mulf %34, %34 : vector<16x32xf32>
      %cst_23 = arith.constant dense<0.000000e+00> : vector<16xf32>
      %37 = vector.multi_reduction <add>, %36, %cst_23 [1] : vector<16x32xf32> to vector<16xf32>
      %38 = vector.shape_cast %37 : vector<16xf32> to vector<16x1xf32>
      %cst_24 = arith.constant 3.200000e+01 : f32
      %39 = vector.broadcast %cst_24 : f32 to vector<16x1xf32>
      %40 = arith.divf %38, %39 : vector<16x1xf32>
      %cst_25 = arith.constant 9.99999997E-7 : f32
      %41 = vector.broadcast %cst_25 : f32 to vector<16x1xf32>
      %42 = arith.addf %40, %41 : vector<16x1xf32>
      %43 = math.rsqrt %42 : vector<16x1xf32>
      %44 = vector.broadcast %43 : vector<16x1xf32> to vector<16x32xf32>
      %45 = arith.mulf %34, %44 : vector<16x32xf32>
      %46 = vector.broadcast %35 : vector<1x32xf32> to vector<16x32xf32>
      %47 = arith.mulf %45, %46 : vector<16x32xf32>
      %c0_26 = arith.constant 0 : index
      %c0_27 = arith.constant 0 : index
      %48 = vector.load %arg7[%c0_26, %c0_27] : memref<16x32xf32, #tpu.memory_space<vmem>>, vector<16x32xf32>
      tpu.vector_store %arg7[%c0_26, %c0_27], %47 {strides = array<i32>} : memref<16x32xf32, #tpu.memory_space<vmem>>, vector<16x32xf32>,
    } else {
    }
    return
  }
  func.func @transform_0(%arg0: i32, %arg1: i32) -> (i32, i32) {
    %c0_i32 = arith.constant 0 : i32
    %c0_i32_0 = arith.constant 0 : i32
    return %arg0, %c0_i32 : i32, i32
  }
  func.func @transform_1(%arg0: i32, %arg1: i32) -> (i32, i32) {
    %c0_i32 = arith.constant 0 : i32
    %c0_i32_0 = arith.constant 0 : i32
    %c0_i32_1 = arith.constant 0 : i32
    return %c0_i32, %c0_i32_0 : i32, i32
  }
  func.func @transform_2(%arg0: i32, %arg1: i32) -> (i32, i32) {
    %c0_i32 = arith.constant 0 : i32
    %c0_i32_0 = arith.constant 0 : i32
    return %c0_i32, %arg1 : i32, i32
  }
  func.func @transform_3(%arg0: i32, %arg1: i32) -> (i32, i32) {
    %c0_i32 = arith.constant 0 : i32
    %c0_i32_0 = arith.constant 0 : i32
    return %arg1, %c0_i32 : i32, i32
  }
  func.func @transform_4(%arg0: i32, %arg1: i32) -> (i32, i32) {
    %c0_i32 = arith.constant 0 : i32
    %c0_i32_0 = arith.constant 0 : i32
    %c0_i32_1 = arith.constant 0 : i32
    return %c0_i32, %c0_i32_0 : i32, i32
  }
  func.func @transform_5(%arg0: i32, %arg1: i32) -> (i32, i32) {
    %c0_i32 = arith.constant 0 : i32
    %c0_i32_0 = arith.constant 0 : i32
    return %arg0, %c0_i32 : i32, i32
  }
}

module attributes {stable_mosaic.version = 11 : i64} {
  func.func @kernel(%arg0: i32, %arg1: i32, %arg2: memref<1x8x32xf32, #tpu.memory_space<vmem>>, %arg3: memref<1x8x32xf32, #tpu.memory_space<vmem>>, %arg4: memref<1x32xf32, #tpu.memory_space<vmem>>, %arg5: memref<32x32xf32, #tpu.memory_space<vmem>>, %arg6: memref<32x64xf32, #tpu.memory_space<vmem>>, %arg7: memref<32x32xf32, #tpu.memory_space<vmem>>, %arg8: memref<1x4x8x8xf32, #tpu.memory_space<vmem>>, %arg9: memref<1x1x8xf32, #tpu.memory_space<vmem>>, %arg10: memref<1x8x32xf32, #tpu.memory_space<vmem>>) attributes {dimension_semantics = [#tpu.dimension_semantics<parallel>, #tpu.dimension_semantics<parallel>], iteration_bounds = array<i64: 2, 1>, scalar_prefetch = 0 : i64, scratch_operands = 0 : i64, tpu.core_type = #tpu.core_type<tc>, window_params = [{transform_indices = @transform_0, window_bounds = array<i64: 1, 8, 32>}, {transform_indices = @transform_1, window_bounds = array<i64: 1, 8, 32>}, {pipeline_mode = #tpu.pipeline_mode<synchronous>, transform_indices = @transform_2, window_bounds = array<i64: 1, 32>}, {pipeline_mode = #tpu.pipeline_mode<synchronous>, transform_indices = @transform_3, window_bounds = array<i64: 32, 32>}, {pipeline_mode = #tpu.pipeline_mode<synchronous>, transform_indices = @transform_4, window_bounds = array<i64: 32, 64>}, {pipeline_mode = #tpu.pipeline_mode<synchronous>, transform_indices = @transform_5, window_bounds = array<i64: 32, 32>}, {transform_indices = @transform_6, window_bounds = array<i64: 1, 4, 8, 8>}, {transform_indices = @transform_7, window_bounds = array<i64: 1, 1, 8>}, {transform_indices = @transform_8, window_bounds = array<i64: 1, 8, 32>}]} {
    %c0 = arith.constant 0 : index
    %c0_0 = arith.constant 0 : index
    %c0_1 = arith.constant 0 : index
    %0 = vector.load %arg2[%c0, %c0_0, %c0_1] : memref<1x8x32xf32, #tpu.memory_space<vmem>>, vector<1x8x32xf32>
    %1 = vector.shape_cast %0 : vector<1x8x32xf32> to vector<8x32xf32>
    %c0_2 = arith.constant 0 : index
    %c0_3 = arith.constant 0 : index
    %c0_4 = arith.constant 0 : index
    %2 = vector.load %arg3[%c0_2, %c0_3, %c0_4] : memref<1x8x32xf32, #tpu.memory_space<vmem>>, vector<1x8x32xf32>
    %3 = vector.shape_cast %2 : vector<1x8x32xf32> to vector<8x32xf32>
    %c0_5 = arith.constant 0 : index
    %c0_6 = arith.constant 0 : index
    %4 = vector.load %arg4[%c0_5, %c0_6] : memref<1x32xf32, #tpu.memory_space<vmem>>, vector<1x32xf32>
    %c0_7 = arith.constant 0 : index
    %c0_8 = arith.constant 0 : index
    %5 = vector.load %arg5[%c0_7, %c0_8] : memref<32x32xf32, #tpu.memory_space<vmem>>, vector<32x32xf32>
    %c0_9 = arith.constant 0 : index
    %c0_10 = arith.constant 0 : index
    %6 = vector.load %arg6[%c0_9, %c0_10] : memref<32x64xf32, #tpu.memory_space<vmem>>, vector<32x64xf32>
    %c0_11 = arith.constant 0 : index
    %c0_12 = arith.constant 0 : index
    %7 = vector.load %arg7[%c0_11, %c0_12] : memref<32x32xf32, #tpu.memory_space<vmem>>, vector<32x32xf32>
    %c0_13 = arith.constant 0 : index
    %c0_14 = arith.constant 0 : index
    %c0_15 = arith.constant 0 : index
    %c0_16 = arith.constant 0 : index
    %8 = vector.load %arg8[%c0_13, %c0_14, %c0_15, %c0_16] : memref<1x4x8x8xf32, #tpu.memory_space<vmem>>, vector<1x4x8x8xf32>
    %9 = vector.shape_cast %8 : vector<1x4x8x8xf32> to vector<4x8x8xf32>
    %c0_17 = arith.constant 0 : index
    %c0_18 = arith.constant 0 : index
    %c0_19 = arith.constant 0 : index
    %10 = vector.load %arg9[%c0_17, %c0_18, %c0_19] : memref<1x1x8xf32, #tpu.memory_space<vmem>>, vector<1x1x8xf32>
    %11 = arith.mulf %1, %1 : vector<8x32xf32>
    %cst = arith.constant dense<0.000000e+00> : vector<8xf32>
    %12 = vector.multi_reduction <add>, %11, %cst [1] : vector<8x32xf32> to vector<8xf32>
    %13 = vector.shape_cast %12 : vector<8xf32> to vector<8x1xf32>
    %cst_20 = arith.constant 3.200000e+01 : f32
    %14 = vector.broadcast %cst_20 : f32 to vector<8x1xf32>
    %15 = arith.divf %13, %14 : vector<8x1xf32>
    %cst_21 = arith.constant 9.99999997E-7 : f32
    %16 = vector.broadcast %cst_21 : f32 to vector<8x1xf32>
    %17 = arith.addf %15, %16 : vector<8x1xf32>
    %18 = math.rsqrt %17 : vector<8x1xf32>
    %19 = vector.broadcast %18 : vector<8x1xf32> to vector<8x32xf32>
    %20 = arith.mulf %1, %19 : vector<8x32xf32>
    %21 = vector.broadcast %4 : vector<1x32xf32> to vector<8x32xf32>
    %22 = arith.mulf %20, %21 : vector<8x32xf32>
    %23 = arith.mulf %3, %3 : vector<8x32xf32>
    %cst_22 = arith.constant dense<0.000000e+00> : vector<8xf32>
    %24 = vector.multi_reduction <add>, %23, %cst_22 [1] : vector<8x32xf32> to vector<8xf32>
    %25 = vector.shape_cast %24 : vector<8xf32> to vector<8x1xf32>
    %cst_23 = arith.constant 3.200000e+01 : f32
    %26 = vector.broadcast %cst_23 : f32 to vector<8x1xf32>
    %27 = arith.divf %25, %26 : vector<8x1xf32>
    %cst_24 = arith.constant 9.99999997E-7 : f32
    %28 = vector.broadcast %cst_24 : f32 to vector<8x1xf32>
    %29 = arith.addf %27, %28 : vector<8x1xf32>
    %30 = math.rsqrt %29 : vector<8x1xf32>
    %31 = vector.broadcast %30 : vector<8x1xf32> to vector<8x32xf32>
    %32 = arith.mulf %3, %31 : vector<8x32xf32>
    %33 = vector.broadcast %4 : vector<1x32xf32> to vector<8x32xf32>
    %34 = arith.mulf %32, %33 : vector<8x32xf32>
    %35 = arith.truncf %22 : vector<8x32xf32> to vector<8x32xbf16>
    %36 = arith.truncf %5 : vector<32x32xf32> to vector<32x32xbf16>
    %cst_25 = arith.constant dense<0.000000e+00> : vector<8x32xf32>
    %37 = tpu.matmul %35, %36, %cst_25 {dimension_numbers = #tpu.dot_dimension_numbers<[1], [0], [0], [1], [0, 0, 1, 1], [], []>} : vector<8x32xbf16>, vector<32x32xbf16>, vector<8x32xf32> -> vector<8x32xf32>
    %38 = arith.truncf %34 : vector<8x32xf32> to vector<8x32xbf16>
    %39 = arith.truncf %6 : vector<32x64xf32> to vector<32x64xbf16>
    %cst_26 = arith.constant dense<0.000000e+00> : vector<8x64xf32>
    %40 = tpu.matmul %38, %39, %cst_26 {dimension_numbers = #tpu.dot_dimension_numbers<[1], [0], [0], [1], [0, 0, 1, 1], [], []>} : vector<8x32xbf16>, vector<32x64xbf16>, vector<8x64xf32> -> vector<8x64xf32>
    %41 = vector.extract_strided_slice %40 {offsets = [0, 0], sizes = [8, 32], strides = [1, 1]} : vector<8x64xf32> to vector<8x32xf32>
    %42 = vector.extract_strided_slice %40 {offsets = [0, 32], sizes = [8, 32], strides = [1, 1]} : vector<8x64xf32> to vector<8x32xf32>
    %43 = vector.shape_cast %37 : vector<8x32xf32> to vector<8x4x8xf32>
    %44 = tpu.transpose %43, [1, 0, 2] : vector<8x4x8xf32> -> vector<4x8x8xf32>
    %45 = vector.shape_cast %41 : vector<8x32xf32> to vector<8x4x8xf32>
    %46 = tpu.transpose %45, [1, 0, 2] : vector<8x4x8xf32> -> vector<4x8x8xf32>
    %47 = vector.shape_cast %42 : vector<8x32xf32> to vector<8x4x8xf32>
    %48 = tpu.transpose %47, [1, 0, 2] : vector<8x4x8xf32> -> vector<4x8x8xf32>
    %49 = arith.truncf %44 : vector<4x8x8xf32> to vector<4x8x8xbf16>
    %50 = arith.truncf %46 : vector<4x8x8xf32> to vector<4x8x8xbf16>
    "tpu.trace_start"() <{level = 10 : i32, message = "hqd,hkd->hqk"}> : () -> ()
    %cst_27 = arith.constant dense<0.000000e+00> : vector<4x8x8xf32>
    %51 = tpu.matmul %49, %50, %cst_27 {dimension_numbers = #tpu.dot_dimension_numbers<[2], [2], [1], [1], [0, 0, 0, 1, 1, 1], [0], [0]>} : vector<4x8x8xbf16>, vector<4x8x8xbf16>, vector<4x8x8xf32> -> vector<4x8x8xf32>
    "tpu.trace_stop"() : () -> ()
    %52 = arith.addf %51, %9 : vector<4x8x8xf32>
    %cst_28 = arith.constant 1.000000e+00 : f32
    %53 = vector.broadcast %cst_28 : f32 to vector<1x1x8xf32>
    %54 = arith.subf %53, %10 : vector<1x1x8xf32>
    %cst_29 = arith.constant -1.000000e+09 : f32
    %55 = vector.broadcast %cst_29 : f32 to vector<1x1x8xf32>
    %56 = arith.mulf %54, %55 : vector<1x1x8xf32>
    %57 = vector.broadcast %56 : vector<1x1x8xf32> to vector<4x8x8xf32>
    %58 = arith.addf %52, %57 : vector<4x8x8xf32>
    %cst_30 = arith.constant dense<0xFF800000> : vector<4x8xf32>
    %59 = vector.multi_reduction <maximumf>, %58, %cst_30 [2] : vector<4x8x8xf32> to vector<4x8xf32>
    %60 = vector.shape_cast %59 : vector<4x8xf32> to vector<4x8x1xf32>
    %61 = vector.broadcast %60 : vector<4x8x1xf32> to vector<4x8x8xf32>
    %62 = arith.subf %58, %61 : vector<4x8x8xf32>
    %63 = math.exp %62 : vector<4x8x8xf32>
    %cst_31 = arith.constant dense<0.000000e+00> : vector<4x8xf32>
    %64 = vector.multi_reduction <add>, %63, %cst_31 [2] : vector<4x8x8xf32> to vector<4x8xf32>
    %65 = vector.shape_cast %64 : vector<4x8xf32> to vector<4x8x1xf32>
    %66 = vector.broadcast %65 : vector<4x8x1xf32> to vector<4x8x8xf32>
    %67 = arith.divf %63, %66 : vector<4x8x8xf32>
    %68 = arith.truncf %67 : vector<4x8x8xf32> to vector<4x8x8xbf16>
    %69 = arith.truncf %48 : vector<4x8x8xf32> to vector<4x8x8xbf16>
    "tpu.trace_start"() <{level = 10 : i32, message = "hqk,hkd->hqd"}> : () -> ()
    %cst_32 = arith.constant dense<0.000000e+00> : vector<4x8x8xf32>
    %70 = tpu.matmul %68, %69, %cst_32 {dimension_numbers = #tpu.dot_dimension_numbers<[2], [1], [1], [2], [0, 0, 0, 1, 1, 2], [0], [0]>} : vector<4x8x8xbf16>, vector<4x8x8xbf16>, vector<4x8x8xf32> -> vector<4x8x8xf32>
    "tpu.trace_stop"() : () -> ()
    %71 = tpu.transpose %70, [1, 0, 2] : vector<4x8x8xf32> -> vector<8x4x8xf32>
    %72 = vector.shape_cast %71 : vector<8x4x8xf32> to vector<8x32xf32>
    %73 = arith.truncf %72 : vector<8x32xf32> to vector<8x32xbf16>
    %74 = arith.truncf %7 : vector<32x32xf32> to vector<32x32xbf16>
    %cst_33 = arith.constant dense<0.000000e+00> : vector<8x32xf32>
    %75 = tpu.matmul %73, %74, %cst_33 {dimension_numbers = #tpu.dot_dimension_numbers<[1], [0], [0], [1], [0, 0, 1, 1], [], []>} : vector<8x32xbf16>, vector<32x32xbf16>, vector<8x32xf32> -> vector<8x32xf32>
    %76 = arith.addf %1, %75 : vector<8x32xf32>
    %c0_34 = arith.constant 0 : index
    %c0_35 = arith.constant 0 : index
    %c0_36 = arith.constant 0 : index
    %77 = vector.load %arg10[%c0_34, %c0_35, %c0_36] : memref<1x8x32xf32, #tpu.memory_space<vmem>>, vector<1x8x32xf32>
    %78 = vector.shape_cast %77 : vector<1x8x32xf32> to vector<8x32xf32>
    %79 = vector.shape_cast %76 : vector<8x32xf32> to vector<1x8x32xf32>
    tpu.vector_store %arg10[%c0_34, %c0_35, %c0_36], %79 {strides = array<i32>} : memref<1x8x32xf32, #tpu.memory_space<vmem>>, vector<1x8x32xf32>,
    return
  }
  func.func @transform_0(%arg0: i32, %arg1: i32) -> (i32, i32, i32) {
    %c0_i32 = arith.constant 0 : i32
    %c0_i32_0 = arith.constant 0 : i32
    return %arg0, %arg1, %c0_i32 : i32, i32, i32
  }
  func.func @transform_1(%arg0: i32, %arg1: i32) -> (i32, i32, i32) {
    %c0_i32 = arith.constant 0 : i32
    %c0_i32_0 = arith.constant 0 : i32
    %c0_i32_1 = arith.constant 0 : i32
    return %arg0, %c0_i32, %c0_i32_0 : i32, i32, i32
  }
  func.func @transform_2(%arg0: i32, %arg1: i32) -> (i32, i32) {
    %c0_i32 = arith.constant 0 : i32
    %c0_i32_0 = arith.constant 0 : i32
    %c0_i32_1 = arith.constant 0 : i32
    return %c0_i32, %c0_i32_0 : i32, i32
  }
  func.func @transform_3(%arg0: i32, %arg1: i32) -> (i32, i32) {
    %c0_i32 = arith.constant 0 : i32
    %c0_i32_0 = arith.constant 0 : i32
    %c0_i32_1 = arith.constant 0 : i32
    return %c0_i32, %c0_i32_0 : i32, i32
  }
  func.func @transform_4(%arg0: i32, %arg1: i32) -> (i32, i32) {
    %c0_i32 = arith.constant 0 : i32
    %c0_i32_0 = arith.constant 0 : i32
    %c0_i32_1 = arith.constant 0 : i32
    return %c0_i32, %c0_i32_0 : i32, i32
  }
  func.func @transform_5(%arg0: i32, %arg1: i32) -> (i32, i32) {
    %c0_i32 = arith.constant 0 : i32
    %c0_i32_0 = arith.constant 0 : i32
    %c0_i32_1 = arith.constant 0 : i32
    return %c0_i32, %c0_i32_0 : i32, i32
  }
  func.func @transform_6(%arg0: i32, %arg1: i32) -> (i32, i32, i32, i32) {
    %c0_i32 = arith.constant 0 : i32
    %c0_i32_0 = arith.constant 0 : i32
    %c0_i32_1 = arith.constant 0 : i32
    %c0_i32_2 = arith.constant 0 : i32
    return %c0_i32, %c0_i32_0, %arg1, %c0_i32_1 : i32, i32, i32, i32
  }
  func.func @transform_7(%arg0: i32, %arg1: i32) -> (i32, i32, i32) {
    %c0_i32 = arith.constant 0 : i32
    %c0_i32_0 = arith.constant 0 : i32
    %c0_i32_1 = arith.constant 0 : i32
    return %arg0, %c0_i32, %c0_i32_0 : i32, i32, i32
  }
  func.func @transform_8(%arg0: i32, %arg1: i32) -> (i32, i32, i32) {
    %c0_i32 = arith.constant 0 : i32
    %c0_i32_0 = arith.constant 0 : i32
    return %arg0, %arg1, %c0_i32 : i32, i32, i32
  }
}

module attributes {stable_mosaic.version = 11 : i64} {
  func.func @kernel(%arg0: i32, %arg1: i32, %arg2: memref<16x32xf32, #tpu.memory_space<vmem>>, %arg3: memref<1x32xf32, #tpu.memory_space<vmem>>, %arg4: memref<32x64xf32, #tpu.memory_space<vmem>>, %arg5: memref<64x32xf32, #tpu.memory_space<vmem>>, %arg6: memref<16x32xf32, #tpu.memory_space<vmem>>, %arg7: memref<16x32xf32, #tpu.memory_space<vmem>>) attributes {dimension_semantics = [#tpu.dimension_semantics<parallel>, #tpu.dimension_semantics<arbitrary>], iteration_bounds = array<i64: 1, 1>, scalar_prefetch = 0 : i64, scratch_operands = 1 : i64, tpu.core_type = #tpu.core_type<tc>, window_params = [{transform_indices = @transform_0, window_bounds = array<i64: 16, 32>}, {pipeline_mode = #tpu.pipeline_mode<synchronous>, transform_indices = @transform_1, window_bounds = array<i64: 1, 32>}, {transform_indices = @transform_2, window_bounds = array<i64: 32, 64>}, {transform_indices = @transform_3, window_bounds = array<i64: 64, 32>}, {transform_indices = @transform_4, window_bounds = array<i64: 16, 32>}]} {
    %c0_i32 = arith.constant 0 : i32
    %0 = arith.cmpi eq, %arg1, %c0_i32 : i32
    %1 = arith.extui %0 : i1 to i32
    %c0_i32_0 = arith.constant 0 : i32
    %2 = arith.cmpi ne, %1, %c0_i32_0 : i32
    scf.if %2 {
      %cst_19 = arith.constant 0.000000e+00 : f32
      %33 = vector.broadcast %cst_19 : f32 to vector<16x32xf32>
      %c0_20 = arith.constant 0 : index
      %c0_21 = arith.constant 0 : index
      %34 = vector.load %arg7[%c0_20, %c0_21] : memref<16x32xf32, #tpu.memory_space<vmem>>, vector<16x32xf32>
      tpu.vector_store %arg7[%c0_20, %c0_21], %33 {strides = array<i32>} : memref<16x32xf32, #tpu.memory_space<vmem>>, vector<16x32xf32>,
    } else {
    }
    %c0 = arith.constant 0 : index
    %c0_1 = arith.constant 0 : index
    %3 = vector.load %arg2[%c0, %c0_1] : memref<16x32xf32, #tpu.memory_space<vmem>>, vector<16x32xf32>
    %c0_2 = arith.constant 0 : index
    %c0_3 = arith.constant 0 : index
    %4 = vector.load %arg3[%c0_2, %c0_3] : memref<1x32xf32, #tpu.memory_space<vmem>>, vector<1x32xf32>
    %5 = arith.mulf %3, %3 : vector<16x32xf32>
    %cst = arith.constant dense<0.000000e+00> : vector<16xf32>
    %6 = vector.multi_reduction <add>, %5, %cst [1] : vector<16x32xf32> to vector<16xf32>
    %7 = vector.shape_cast %6 : vector<16xf32> to vector<16x1xf32>
    %cst_4 = arith.constant 3.200000e+01 : f32
    %8 = vector.broadcast %cst_4 : f32 to vector<16x1xf32>
    %9 = arith.divf %7, %8 : vector<16x1xf32>
    %cst_5 = arith.constant 9.99999997E-7 : f32
    %10 = vector.broadcast %cst_5 : f32 to vector<16x1xf32>
    %11 = arith.addf %9, %10 : vector<16x1xf32>
    %12 = math.rsqrt %11 : vector<16x1xf32>
    %13 = vector.broadcast %12 : vector<16x1xf32> to vector<16x32xf32>
    %14 = arith.mulf %3, %13 : vector<16x32xf32>
    %15 = vector.broadcast %4 : vector<1x32xf32> to vector<16x32xf32>
    %16 = arith.mulf %14, %15 : vector<16x32xf32>
    %17 = arith.truncf %16 : vector<16x32xf32> to vector<16x32xbf16>
    %c0_6 = arith.constant 0 : index
    %c0_7 = arith.constant 0 : index
    %18 = vector.load %arg4[%c0_6, %c0_7] : memref<32x64xf32, #tpu.memory_space<vmem>>, vector<32x64xf32>
    %19 = arith.truncf %18 : vector<32x64xf32> to vector<32x64xbf16>
    %cst_8 = arith.constant dense<0.000000e+00> : vector<16x64xf32>
    %20 = tpu.matmul %17, %19, %cst_8 {dimension_numbers = #tpu.dot_dimension_numbers<[1], [0], [0], [1], [0, 0, 1, 1], [], []>} : vector<16x32xbf16>, vector<32x64xbf16>, vector<16x64xf32> -> vector<16x64xf32>
    %cst_9 = arith.constant 0.000000e+00 : f32
    %21 = vector.broadcast %cst_9 : f32 to vector<16x64xf32>
    %22 = arith.maximumf %20, %21 : vector<16x64xf32>
    %c0_10 = arith.constant 0 : index
    %c0_11 = arith.constant 0 : index
    %23 = vector.load %arg7[%c0_10, %c0_11] : memref<16x32xf32, #tpu.memory_space<vmem>>, vector<16x32xf32>
    %24 = arith.truncf %22 : vector<16x64xf32> to vector<16x64xbf16>
    %c0_12 = arith.constant 0 : index
    %c0_13 = arith.constant 0 : index
    %25 = vector.load %arg5[%c0_12, %c0_13] : memref<64x32xf32, #tpu.memory_space<vmem>>, vector<64x32xf32>
    %26 = arith.truncf %25 : vector<64x32xf32> to vector<64x32xbf16>
    %cst_14 = arith.constant dense<0.000000e+00> : vector<16x32xf32>
    %27 = tpu.matmul %24, %26, %cst_14 {dimension_numbers = #tpu.dot_dimension_numbers<[1], [0], [0], [1], [0, 0, 1, 1], [], []>} : vector<16x64xbf16>, vector<64x32xbf16>, vector<16x32xf32> -> vector<16x32xf32>
    %28 = arith.addf %23, %27 : vector<16x32xf32>
    %c0_15 = arith.constant 0 : index
    %c0_16 = arith.constant 0 : index
    %29 = vector.load %arg7[%c0_15, %c0_16] : memref<16x32xf32, #tpu.memory_space<vmem>>, vector<16x32xf32>
    tpu.vector_store %arg7[%c0_15, %c0_16], %28 {strides = array<i32>} : memref<16x32xf32, #tpu.memory_space<vmem>>, vector<16x32xf32>,
    %c0_i32_17 = arith.constant 0 : i32
    %30 = arith.cmpi eq, %arg1, %c0_i32_17 : i32
    %31 = arith.extui %30 : i1 to i32
    %c0_i32_18 = arith.constant 0 : i32
    %32 = arith.cmpi ne, %31, %c0_i32_18 : i32
    scf.if %32 {
      %c0_19 = arith.constant 0 : index
      %c0_20 = arith.constant 0 : index
      %33 = vector.load %arg7[%c0_19, %c0_20] : memref<16x32xf32, #tpu.memory_space<vmem>>, vector<16x32xf32>
      %34 = arith.addf %33, %3 : vector<16x32xf32>
      %c0_21 = arith.constant 0 : index
      %c0_22 = arith.constant 0 : index
      %35 = vector.load %arg6[%c0_21, %c0_22] : memref<16x32xf32, #tpu.memory_space<vmem>>, vector<16x32xf32>
      tpu.vector_store %arg6[%c0_21, %c0_22], %34 {strides = array<i32>} : memref<16x32xf32, #tpu.memory_space<vmem>>, vector<16x32xf32>,
    } else {
    }
    return
  }
  func.func @transform_0(%arg0: i32, %arg1: i32) -> (i32, i32) {
    %c0_i32 = arith.constant 0 : i32
    %c0_i32_0 = arith.constant 0 : i32
    return %arg0, %c0_i32 : i32, i32
  }
  func.func @transform_1(%arg0: i32, %arg1: i32) -> (i32, i32) {
    %c0_i32 = arith.constant 0 : i32
    %c0_i32_0 = arith.constant 0 : i32
    %c0_i32_1 = arith.constant 0 : i32
    return %c0_i32, %c0_i32_0 : i32, i32
  }
  func.func @transform_2(%arg0: i32, %arg1: i32) -> (i32, i32) {
    %c0_i32 = arith.constant 0 : i32
    %c0_i32_0 = arith.constant 0 : i32
    return %c0_i32, %arg1 : i32, i32
  }
  func.func @transform_3(%arg0: i32, %arg1: i32) -> (i32, i32) {
    %c0_i32 = arith.constant 0 : i32
    %c0_i32_0 = arith.constant 0 : i32
    return %arg1, %c0_i32 : i32, i32
  }
  func.func @transform_4(%arg0: i32, %arg1: i32) -> (i32, i32) {
    %c0_i32 = arith.constant 0 : i32
    %c0_i32_0 = arith.constant 0 : i32
    return %arg0, %c0_i32 : i32, i32
  }
}

module attributes {stable_mosaic.version = 11 : i64} {
  func.func @kernel(%arg0: i32, %arg1: i32, %arg2: memref<1x8x32xf32, #tpu.memory_space<vmem>>, %arg3: memref<1x8x32xf32, #tpu.memory_space<vmem>>, %arg4: memref<1x32xf32, #tpu.memory_space<vmem>>, %arg5: memref<32x32xf32, #tpu.memory_space<vmem>>, %arg6: memref<32x64xf32, #tpu.memory_space<vmem>>, %arg7: memref<32x32xf32, #tpu.memory_space<vmem>>, %arg8: memref<1x1x8xf32, #tpu.memory_space<vmem>>, %arg9: memref<1x8x32xf32, #tpu.memory_space<vmem>>) attributes {dimension_semantics = [#tpu.dimension_semantics<parallel>, #tpu.dimension_semantics<parallel>], iteration_bounds = array<i64: 2, 1>, scalar_prefetch = 0 : i64, scratch_operands = 0 : i64, tpu.core_type = #tpu.core_type<tc>, window_params = [{transform_indices = @transform_0, window_bounds = array<i64: 1, 8, 32>}, {transform_indices = @transform_1, window_bounds = array<i64: 1, 8, 32>}, {pipeline_mode = #tpu.pipeline_mode<synchronous>, transform_indices = @transform_2, window_bounds = array<i64: 1, 32>}, {pipeline_mode = #tpu.pipeline_mode<synchronous>, transform_indices = @transform_3, window_bounds = array<i64: 32, 32>}, {pipeline_mode = #tpu.pipeline_mode<synchronous>, transform_indices = @transform_4, window_bounds = array<i64: 32, 64>}, {pipeline_mode = #tpu.pipeline_mode<synchronous>, transform_indices = @transform_5, window_bounds = array<i64: 32, 32>}, {transform_indices = @transform_6, window_bounds = array<i64: 1, 1, 8>}, {transform_indices = @transform_7, window_bounds = array<i64: 1, 8, 32>}]} {
    %c0 = arith.constant 0 : index
    %c0_0 = arith.constant 0 : index
    %c0_1 = arith.constant 0 : index
    %0 = vector.load %arg2[%c0, %c0_0, %c0_1] : memref<1x8x32xf32, #tpu.memory_space<vmem>>, vector<1x8x32xf32>
    %1 = vector.shape_cast %0 : vector<1x8x32xf32> to vector<8x32xf32>
    %c0_2 = arith.constant 0 : index
    %c0_3 = arith.constant 0 : index
    %c0_4 = arith.constant 0 : index
    %2 = vector.load %arg3[%c0_2, %c0_3, %c0_4] : memref<1x8x32xf32, #tpu.memory_space<vmem>>, vector<1x8x32xf32>
    %3 = vector.shape_cast %2 : vector<1x8x32xf32> to vector<8x32xf32>
    %c0_5 = arith.constant 0 : index
    %c0_6 = arith.constant 0 : index
    %4 = vector.load %arg4[%c0_5, %c0_6] : memref<1x32xf32, #tpu.memory_space<vmem>>, vector<1x32xf32>
    %c0_7 = arith.constant 0 : index
    %c0_8 = arith.constant 0 : index
    %5 = vector.load %arg5[%c0_7, %c0_8] : memref<32x32xf32, #tpu.memory_space<vmem>>, vector<32x32xf32>
    %c0_9 = arith.constant 0 : index
    %c0_10 = arith.constant 0 : index
    %6 = vector.load %arg6[%c0_9, %c0_10] : memref<32x64xf32, #tpu.memory_space<vmem>>, vector<32x64xf32>
    %c0_11 = arith.constant 0 : index
    %c0_12 = arith.constant 0 : index
    %7 = vector.load %arg7[%c0_11, %c0_12] : memref<32x32xf32, #tpu.memory_space<vmem>>, vector<32x32xf32>
    %c0_13 = arith.constant 0 : index
    %c0_14 = arith.constant 0 : index
    %c0_15 = arith.constant 0 : index
    %8 = vector.load %arg8[%c0_13, %c0_14, %c0_15] : memref<1x1x8xf32, #tpu.memory_space<vmem>>, vector<1x1x8xf32>
    %9 = arith.mulf %1, %1 : vector<8x32xf32>
    %cst = arith.constant dense<0.000000e+00> : vector<8xf32>
    %10 = vector.multi_reduction <add>, %9, %cst [1] : vector<8x32xf32> to vector<8xf32>
    %11 = vector.shape_cast %10 : vector<8xf32> to vector<8x1xf32>
    %cst_16 = arith.constant 3.200000e+01 : f32
    %12 = vector.broadcast %cst_16 : f32 to vector<8x1xf32>
    %13 = arith.divf %11, %12 : vector<8x1xf32>
    %cst_17 = arith.constant 9.99999997E-7 : f32
    %14 = vector.broadcast %cst_17 : f32 to vector<8x1xf32>
    %15 = arith.addf %13, %14 : vector<8x1xf32>
    %16 = math.rsqrt %15 : vector<8x1xf32>
    %17 = vector.broadcast %16 : vector<8x1xf32> to vector<8x32xf32>
    %18 = arith.mulf %1, %17 : vector<8x32xf32>
    %19 = vector.broadcast %4 : vector<1x32xf32> to vector<8x32xf32>
    %20 = arith.mulf %18, %19 : vector<8x32xf32>
    %21 = arith.truncf %20 : vector<8x32xf32> to vector<8x32xbf16>
    %22 = arith.truncf %5 : vector<32x32xf32> to vector<32x32xbf16>
    %cst_18 = arith.constant dense<0.000000e+00> : vector<8x32xf32>
    %23 = tpu.matmul %21, %22, %cst_18 {dimension_numbers = #tpu.dot_dimension_numbers<[1], [0], [0], [1], [0, 0, 1, 1], [], []>} : vector<8x32xbf16>, vector<32x32xbf16>, vector<8x32xf32> -> vector<8x32xf32>
    %24 = arith.truncf %3 : vector<8x32xf32> to vector<8x32xbf16>
    %25 = arith.truncf %6 : vector<32x64xf32> to vector<32x64xbf16>
    %cst_19 = arith.constant dense<0.000000e+00> : vector<8x64xf32>
    %26 = tpu.matmul %24, %25, %cst_19 {dimension_numbers = #tpu.dot_dimension_numbers<[1], [0], [0], [1], [0, 0, 1, 1], [], []>} : vector<8x32xbf16>, vector<32x64xbf16>, vector<8x64xf32> -> vector<8x64xf32>
    %27 = vector.extract_strided_slice %26 {offsets = [0, 0], sizes = [8, 32], strides = [1, 1]} : vector<8x64xf32> to vector<8x32xf32>
    %28 = vector.extract_strided_slice %26 {offsets = [0, 32], sizes = [8, 32], strides = [1, 1]} : vector<8x64xf32> to vector<8x32xf32>
    %29 = vector.shape_cast %23 : vector<8x32xf32> to vector<8x4x8xf32>
    %30 = tpu.transpose %29, [1, 0, 2] : vector<8x4x8xf32> -> vector<4x8x8xf32>
    %31 = vector.shape_cast %27 : vector<8x32xf32> to vector<8x4x8xf32>
    %32 = tpu.transpose %31, [1, 0, 2] : vector<8x4x8xf32> -> vector<4x8x8xf32>
    %33 = vector.shape_cast %28 : vector<8x32xf32> to vector<8x4x8xf32>
    %34 = tpu.transpose %33, [1, 0, 2] : vector<8x4x8xf32> -> vector<4x8x8xf32>
    %35 = arith.truncf %30 : vector<4x8x8xf32> to vector<4x8x8xbf16>
    %36 = arith.truncf %32 : vector<4x8x8xf32> to vector<4x8x8xbf16>
    "tpu.trace_start"() <{level = 10 : i32, message = "hqd,hkd->hqk"}> : () -> ()
    %cst_20 = arith.constant dense<0.000000e+00> : vector<4x8x8xf32>
    %37 = tpu.matmul %35, %36, %cst_20 {dimension_numbers = #tpu.dot_dimension_numbers<[2], [2], [1], [1], [0, 0, 0, 1, 1, 1], [0], [0]>} : vector<4x8x8xbf16>, vector<4x8x8xbf16>, vector<4x8x8xf32> -> vector<4x8x8xf32>
    "tpu.trace_stop"() : () -> ()
    %cst_21 = arith.constant 1.000000e+00 : f32
    %38 = vector.broadcast %cst_21 : f32 to vector<1x1x8xf32>
    %39 = arith.subf %38, %8 : vector<1x1x8xf32>
    %cst_22 = arith.constant -1.000000e+09 : f32
    %40 = vector.broadcast %cst_22 : f32 to vector<1x1x8xf32>
    %41 = arith.mulf %39, %40 : vector<1x1x8xf32>
    %42 = vector.broadcast %41 : vector<1x1x8xf32> to vector<4x8x8xf32>
    %43 = arith.addf %37, %42 : vector<4x8x8xf32>
    %cst_23 = arith.constant dense<0xFF800000> : vector<4x8xf32>
    %44 = vector.multi_reduction <maximumf>, %43, %cst_23 [2] : vector<4x8x8xf32> to vector<4x8xf32>
    %45 = vector.shape_cast %44 : vector<4x8xf32> to vector<4x8x1xf32>
    %46 = vector.broadcast %45 : vector<4x8x1xf32> to vector<4x8x8xf32>
    %47 = arith.subf %43, %46 : vector<4x8x8xf32>
    %48 = math.exp %47 : vector<4x8x8xf32>
    %cst_24 = arith.constant dense<0.000000e+00> : vector<4x8xf32>
    %49 = vector.multi_reduction <add>, %48, %cst_24 [2] : vector<4x8x8xf32> to vector<4x8xf32>
    %50 = vector.shape_cast %49 : vector<4x8xf32> to vector<4x8x1xf32>
    %51 = vector.broadcast %50 : vector<4x8x1xf32> to vector<4x8x8xf32>
    %52 = arith.divf %48, %51 : vector<4x8x8xf32>
    %53 = arith.truncf %52 : vector<4x8x8xf32> to vector<4x8x8xbf16>
    %54 = arith.truncf %34 : vector<4x8x8xf32> to vector<4x8x8xbf16>
    "tpu.trace_start"() <{level = 10 : i32, message = "hqk,hkd->hqd"}> : () -> ()
    %cst_25 = arith.constant dense<0.000000e+00> : vector<4x8x8xf32>
    %55 = tpu.matmul %53, %54, %cst_25 {dimension_numbers = #tpu.dot_dimension_numbers<[2], [1], [1], [2], [0, 0, 0, 1, 1, 2], [0], [0]>} : vector<4x8x8xbf16>, vector<4x8x8xbf16>, vector<4x8x8xf32> -> vector<4x8x8xf32>
    "tpu.trace_stop"() : () -> ()
    %56 = tpu.transpose %55, [1, 0, 2] : vector<4x8x8xf32> -> vector<8x4x8xf32>
    %57 = vector.shape_cast %56 : vector<8x4x8xf32> to vector<8x32xf32>
    %58 = arith.truncf %57 : vector<8x32xf32> to vector<8x32xbf16>
    %59 = arith.truncf %7 : vector<32x32xf32> to vector<32x32xbf16>
    %cst_26 = arith.constant dense<0.000000e+00> : vector<8x32xf32>
    %60 = tpu.matmul %58, %59, %cst_26 {dimension_numbers = #tpu.dot_dimension_numbers<[1], [0], [0], [1], [0, 0, 1, 1], [], []>} : vector<8x32xbf16>, vector<32x32xbf16>, vector<8x32xf32> -> vector<8x32xf32>
    %61 = arith.addf %1, %60 : vector<8x32xf32>
    %c0_27 = arith.constant 0 : index
    %c0_28 = arith.constant 0 : index
    %c0_29 = arith.constant 0 : index
    %62 = vector.load %arg9[%c0_27, %c0_28, %c0_29] : memref<1x8x32xf32, #tpu.memory_space<vmem>>, vector<1x8x32xf32>
    %63 = vector.shape_cast %62 : vector<1x8x32xf32> to vector<8x32xf32>
    %64 = vector.shape_cast %61 : vector<8x32xf32> to vector<1x8x32xf32>
    tpu.vector_store %arg9[%c0_27, %c0_28, %c0_29], %64 {strides = array<i32>} : memref<1x8x32xf32, #tpu.memory_space<vmem>>, vector<1x8x32xf32>,
    return
  }
  func.func @transform_0(%arg0: i32, %arg1: i32) -> (i32, i32, i32) {
    %c0_i32 = arith.constant 0 : i32
    %c0_i32_0 = arith.constant 0 : i32
    return %arg0, %arg1, %c0_i32 : i32, i32, i32
  }
  func.func @transform_1(%arg0: i32, %arg1: i32) -> (i32, i32, i32) {
    %c0_i32 = arith.constant 0 : i32
    %c0_i32_0 = arith.constant 0 : i32
    %c0_i32_1 = arith.constant 0 : i32
    return %arg0, %c0_i32, %c0_i32_0 : i32, i32, i32
  }
  func.func @transform_2(%arg0: i32, %arg1: i32) -> (i32, i32) {
    %c0_i32 = arith.constant 0 : i32
    %c0_i32_0 = arith.constant 0 : i32
    %c0_i32_1 = arith.constant 0 : i32
    return %c0_i32, %c0_i32_0 : i32, i32
  }
  func.func @transform_3(%arg0: i32, %arg1: i32) -> (i32, i32) {
    %c0_i32 = arith.constant 0 : i32
    %c0_i32_0 = arith.constant 0 : i32
    %c0_i32_1 = arith.constant 0 : i32
    return %c0_i32, %c0_i32_0 : i32, i32
  }
  func.func @transform_4(%arg0: i32, %arg1: i32) -> (i32, i32) {
    %c0_i32 = arith.constant 0 : i32
    %c0_i32_0 = arith.constant 0 : i32
    %c0_i32_1 = arith.constant 0 : i32
    return %c0_i32, %c0_i32_0 : i32, i32
  }
  func.func @transform_5(%arg0: i32, %arg1: i32) -> (i32, i32) {
    %c0_i32 = arith.constant 0 : i32
    %c0_i32_0 = arith.constant 0 : i32
    %c0_i32_1 = arith.constant 0 : i32
    return %c0_i32, %c0_i32_0 : i32, i32
  }
  func.func @transform_6(%arg0: i32, %arg1: i32) -> (i32, i32, i32) {
    %c0_i32 = arith.constant 0 : i32
    %c0_i32_0 = arith.constant 0 : i32
    %c0_i32_1 = arith.constant 0 : i32
    return %arg0, %c0_i32, %c0_i32_0 : i32, i32, i32
  }
  func.func @transform_7(%arg0: i32, %arg1: i32) -> (i32, i32, i32) {
    %c0_i32 = arith.constant 0 : i32
    %c0_i32_0 = arith.constant 0 : i32
    return %arg0, %arg1, %c0_i32 : i32, i32, i32
  }
}

module attributes {stable_mosaic.version = 11 : i64} {
  func.func @kernel(%arg0: i32, %arg1: i32, %arg2: memref<16x32xf32, #tpu.memory_space<vmem>>, %arg3: memref<1x32xf32, #tpu.memory_space<vmem>>, %arg4: memref<128x32xf32, #tpu.memory_space<vmem>>, %arg5: memref<16x128xf32, #tpu.memory_space<vmem>>, %arg6: memref<16x1xf32, #tpu.memory_space<vmem>>, %arg7: memref<16x1xf32, #tpu.memory_space<vmem>>, %arg8: memref<16x1xf32, #tpu.memory_space<vmem>>) attributes {dimension_semantics = [#tpu.dimension_semantics<parallel>, #tpu.dimension_semantics<arbitrary>], iteration_bounds = array<i64: 1, 1>, scalar_prefetch = 0 : i64, scratch_operands = 2 : i64, tpu.core_type = #tpu.core_type<tc>, window_params = [{transform_indices = @transform_0, window_bounds = array<i64: 16, 32>}, {pipeline_mode = #tpu.pipeline_mode<synchronous>, transform_indices = @transform_1, window_bounds = array<i64: 1, 32>}, {transform_indices = @transform_2, window_bounds = array<i64: 128, 32>}, {transform_indices = @transform_3, window_bounds = array<i64: 16, 128>}, {transform_indices = @transform_4, window_bounds = array<i64: 16, 1>}]} {
    %c0_i32 = arith.constant 0 : i32
    %0 = arith.cmpi eq, %arg1, %c0_i32 : i32
    %1 = arith.extui %0 : i1 to i32
    %c0_i32_0 = arith.constant 0 : i32
    %2 = arith.cmpi ne, %1, %c0_i32_0 : i32
    scf.if %2 {
      %cst_26 = arith.constant 0xFF800000 : f32
      %44 = vector.broadcast %cst_26 : f32 to vector<16x1xf32>
      %c0_27 = arith.constant 0 : index
      %c0_28 = arith.constant 0 : index
      %45 = vector.load %arg7[%c0_27, %c0_28] : memref<16x1xf32, #tpu.memory_space<vmem>>, vector<16x1xf32>
      tpu.vector_store %arg7[%c0_27, %c0_28], %44 {strides = array<i32>} : memref<16x1xf32, #tpu.memory_space<vmem>>, vector<16x1xf32>,
      %cst_29 = arith.constant 0.000000e+00 : f32
      %46 = vector.broadcast %cst_29 : f32 to vector<16x1xf32>
      %c0_30 = arith.constant 0 : index
      %c0_31 = arith.constant 0 : index
      %47 = vector.load %arg8[%c0_30, %c0_31] : memref<16x1xf32, #tpu.memory_space<vmem>>, vector<16x1xf32>
      tpu.vector_store %arg8[%c0_30, %c0_31], %46 {strides = array<i32>} : memref<16x1xf32, #tpu.memory_space<vmem>>, vector<16x1xf32>,
    } else {
    }
    %c0 = arith.constant 0 : index
    %c0_1 = arith.constant 0 : index
    %3 = vector.load %arg2[%c0, %c0_1] : memref<16x32xf32, #tpu.memory_space<vmem>>, vector<16x32xf32>
    %c0_2 = arith.constant 0 : index
    %c0_3 = arith.constant 0 : index
    %4 = vector.load %arg3[%c0_2, %c0_3] : memref<1x32xf32, #tpu.memory_space<vmem>>, vector<1x32xf32>
    %5 = arith.mulf %3, %3 : vector<16x32xf32>
    %cst = arith.constant dense<0.000000e+00> : vector<16xf32>
    %6 = vector.multi_reduction <add>, %5, %cst [1] : vector<16x32xf32> to vector<16xf32>
    %7 = vector.shape_cast %6 : vector<16xf32> to vector<16x1xf32>
    %cst_4 = arith.constant 3.200000e+01 : f32
    %8 = vector.broadcast %cst_4 : f32 to vector<16x1xf32>
    %9 = arith.divf %7, %8 : vector<16x1xf32>
    %cst_5 = arith.constant 9.99999997E-7 : f32
    %10 = vector.broadcast %cst_5 : f32 to vector<16x1xf32>
    %11 = arith.addf %9, %10 : vector<16x1xf32>
    %12 = math.rsqrt %11 : vector<16x1xf32>
    %13 = vector.broadcast %12 : vector<16x1xf32> to vector<16x32xf32>
    %14 = arith.mulf %3, %13 : vector<16x32xf32>
    %15 = vector.broadcast %4 : vector<1x32xf32> to vector<16x32xf32>
    %16 = arith.mulf %14, %15 : vector<16x32xf32>
    %cst_6 = arith.constant 0.176776692 : f32
    %17 = vector.broadcast %cst_6 : f32 to vector<16x32xf32>
    %18 = arith.mulf %16, %17 : vector<16x32xf32>
    %19 = arith.truncf %18 : vector<16x32xf32> to vector<16x32xbf16>
    %c0_7 = arith.constant 0 : index
    %c0_8 = arith.constant 0 : index
    %20 = vector.load %arg4[%c0_7, %c0_8] : memref<128x32xf32, #tpu.memory_space<vmem>>, vector<128x32xf32>
    %21 = arith.truncf %20 : vector<128x32xf32> to vector<128x32xbf16>
    %cst_9 = arith.constant dense<0.000000e+00> : vector<16x128xf32>
    %22 = tpu.matmul %19, %21, %cst_9 {dimension_numbers = #tpu.dot_dimension_numbers<[1], [1], [0], [0], [0, 0, 1, 0], [], []>} : vector<16x32xbf16>, vector<128x32xbf16>, vector<16x128xf32> -> vector<16x128xf32>
    %c0_10 = arith.constant 0 : index
    %c0_11 = arith.constant 0 : index
    %23 = vector.load %arg5[%c0_10, %c0_11] : memref<16x128xf32, #tpu.memory_space<vmem>>, vector<16x128xf32>
    tpu.vector_store %arg5[%c0_10, %c0_11], %22 {strides = array<i32>} : memref<16x128xf32, #tpu.memory_space<vmem>>, vector<16x128xf32>,
    %c0_12 = arith.constant 0 : index
    %c0_13 = arith.constant 0 : index
    %24 = vector.load %arg7[%c0_12, %c0_13] : memref<16x1xf32, #tpu.memory_space<vmem>>, vector<16x1xf32>
    %cst_14 = arith.constant dense<0xFF800000> : vector<16xf32>
    %25 = vector.multi_reduction <maximumf>, %22, %cst_14 [1] : vector<16x128xf32> to vector<16xf32>
    %26 = vector.shape_cast %25 : vector<16xf32> to vector<16x1xf32>
    %27 = arith.maximumf %24, %26 : vector<16x1xf32>
    %c0_15 = arith.constant 0 : index
    %c0_16 = arith.constant 0 : index
    %28 = vector.load %arg8[%c0_15, %c0_16] : memref<16x1xf32, #tpu.memory_space<vmem>>, vector<16x1xf32>
    %c0_17 = arith.constant 0 : index
    %c0_18 = arith.constant 0 : index
    %29 = vector.load %arg7[%c0_17, %c0_18] : memref<16x1xf32, #tpu.memory_space<vmem>>, vector<16x1xf32>
    %30 = arith.subf %29, %27 : vector<16x1xf32>
    %31 = math.exp %30 : vector<16x1xf32>
    %32 = arith.mulf %28, %31 : vector<16x1xf32>
    %33 = vector.broadcast %27 : vector<16x1xf32> to vector<16x128xf32>
    %34 = arith.subf %22, %33 : vector<16x128xf32>
    %35 = math.exp %34 : vector<16x128xf32>
    %cst_19 = arith.constant dense<0.000000e+00> : vector<16xf32>
    %36 = vector.multi_reduction <add>, %35, %cst_19 [1] : vector<16x128xf32> to vector<16xf32>
    %37 = vector.shape_cast %36 : vector<16xf32> to vector<16x1xf32>
    %38 = arith.addf %32, %37 : vector<16x1xf32>
    %c0_20 = arith.constant 0 : index
    %c0_21 = arith.constant 0 : index
    %39 = vector.load %arg8[%c0_20, %c0_21] : memref<16x1xf32, #tpu.memory_space<vmem>>, vector<16x1xf32>
    tpu.vector_store %arg8[%c0_20, %c0_21], %38 {strides = array<i32>} : memref<16x1xf32, #tpu.memory_space<vmem>>, vector<16x1xf32>,
    %c0_22 = arith.constant 0 : index
    %c0_23 = arith.constant 0 : index
    %40 = vector.load %arg7[%c0_22, %c0_23] : memref<16x1xf32, #tpu.memory_space<vmem>>, vector<16x1xf32>
    tpu.vector_store %arg7[%c0_22, %c0_23], %27 {strides = array<i32>} : memref<16x1xf32, #tpu.memory_space<vmem>>, vector<16x1xf32>,
    %c0_i32_24 = arith.constant 0 : i32
    %41 = arith.cmpi eq, %arg1, %c0_i32_24 : i32
    %42 = arith.extui %41 : i1 to i32
    %c0_i32_25 = arith.constant 0 : i32
    %43 = arith.cmpi ne, %42, %c0_i32_25 : i32
    scf.if %43 {
      %c0_26 = arith.constant 0 : index
      %c0_27 = arith.constant 0 : index
      %44 = vector.load %arg7[%c0_26, %c0_27] : memref<16x1xf32, #tpu.memory_space<vmem>>, vector<16x1xf32>
      %c0_28 = arith.constant 0 : index
      %c0_29 = arith.constant 0 : index
      %45 = vector.load %arg8[%c0_28, %c0_29] : memref<16x1xf32, #tpu.memory_space<vmem>>, vector<16x1xf32>
      %46 = math.log %45 : vector<16x1xf32>
      %47 = arith.addf %44, %46 : vector<16x1xf32>
      %c0_30 = arith.constant 0 : index
      %c0_31 = arith.constant 0 : index
      %48 = vector.load %arg6[%c0_30, %c0_31] : memref<16x1xf32, #tpu.memory_space<vmem>>, vector<16x1xf32>
      tpu.vector_store %arg6[%c0_30, %c0_31], %47 {strides = array<i32>} : memref<16x1xf32, #tpu.memory_space<vmem>>, vector<16x1xf32>,
    } else {
    }
    return
  }
  func.func @transform_0(%arg0: i32, %arg1: i32) -> (i32, i32) {
    %c0_i32 = arith.constant 0 : i32
    %c0_i32_0 = arith.constant 0 : i32
    return %arg0, %c0_i32 : i32, i32
  }
  func.func @transform_1(%arg0: i32, %arg1: i32) -> (i32, i32) {
    %c0_i32 = arith.constant 0 : i32
    %c0_i32_0 = arith.constant 0 : i32
    %c0_i32_1 = arith.constant 0 : i32
    return %c0_i32, %c0_i32_0 : i32, i32
  }
  func.func @transform_2(%arg0: i32, %arg1: i32) -> (i32, i32) {
    %c0_i32 = arith.constant 0 : i32
    %c0_i32_0 = arith.constant 0 : i32
    return %arg1, %c0_i32 : i32, i32
  }
  func.func @transform_3(%arg0: i32, %arg1: i32) -> (i32, i32) {
    %c0_i32 = arith.constant 0 : i32
    return %arg0, %arg1 : i32, i32
  }
  func.func @transform_4(%arg0: i32, %arg1: i32) -> (i32, i32) {
    %c0_i32 = arith.constant 0 : i32
    %c0_i32_0 = arith.constant 0 : i32
    return %arg0, %c0_i32 : i32, i32
  }
}

</mosaic_0001>

<bundles_post_ra>
// kernel: _lambda_.14
= control target key start
LH: loop header
LB: loop body
LE: loop exit
PB: predicated region body
PF: predicated region fallthrough
CT: control target
= control target key end

     0   :  { %vm25_vm0 = vcmask 261120   ;;  %v254_v6 = vmov 0.0   ;;  %vm255_vm1 = vmmov 0   ;;  %vm125_vm2 = vcmask 523264   ;;  %s363_s0 = inlined_call_operand.vmem [shape: f32[16,32], index: 0, kind: input, shape index: {}]   ;;  %s364_s2 = inlined_call_operand.vmem [shape: f32[32,64], index: 2, kind: input, shape index: {}]   ;;  %s365_s3 = inlined_call_operand.vmem [shape: f32[64,32], index: 3, kind: input, shape index: {}]   ;;  %s366_s1 = inlined_call_operand.vmem [shape: f32[1,32], index: 1, kind: input, shape index: {}]   ;;  %s367_s4 = inlined_call_operand.vmem [shape: f32[1,32], index: 4, kind: input, shape index: {}]   ;;  %s368_s5 = inlined_call_operand.vmem [shape: f32[16,32], index: 5, kind: output, shape index: {}]  }
   0x1   :  { %v289_v0 = vld [vmem:[%s363_s0] sm:$0xff]  ;;  %v294_v1 = vld [vmem:[%s363_s0 + $0x8] sm:$0xff]  ;;  %224 = vmatprep.subr.bf16.mxu0 %v254_v6  ;;  %26 = vst.msk [vmem:[#allocation2] sm:$0xff] %vm25_vm0, %v254_v6  ;;  %27 = vst.msk [vmem:[#allocation2 + $0x8] sm:$0xff] %vm25_vm0, %v254_v6  ;;  %228 = vmatprep.mubr.msk.bf16.mxu0 %vm255_vm1, %v254_v6 }
   0x2   :  { %v31_v2 = vmul.f32 %v289_v0, %v289_v0  ;;  %v32_v3 = vmul.f32 %v294_v1, %v294_v1  ;;  %v60_v7 = vld [vmem:[%s364_s2 + $0x10] sm:$0xff]  ;;  %v61_v8 = vld [vmem:[%s364_s2 + $0x18] sm:$0xff]  ;;  %v58_v9 = vld [vmem:[%s364_s2] sm:$0xff]  ;;  %232 = vmatprep.subr.bf16.mxu1 %v254_v6  ;;  %240 = vmatprep.mubr.msk.bf16.mxu1 %vm255_vm1, %v254_v6 }
   0x3   :  { %v63_v10 = vpack.c.bf16 %v61_v8, %v60_v7  ;;  %v59_v11 = vld [vmem:[%s364_s2 + $0x8] sm:$0xff]  ;;  %v119_v13 = vld [vmem:[%s365_s3 + $0x30] sm:$0xff]  ;;  %v120_v14 = vld [vmem:[%s365_s3 + $0x38] sm:$0xff] }
   0x4   :  { %v34_v4 = vsel %vm25_vm0, %v31_v2, 0.0  ;;  %v37_v5 = vsel %vm25_vm0, %v32_v3, 0.0  ;;  %v62_v12 = vpack.c.bf16 %v59_v11, %v58_v9  ;;  %v117_v15 = vld [vmem:[%s365_s3 + $0x20] sm:$0xff]  ;;  %v124_v16 = vpack.c.bf16 %v120_v14, %v119_v13  ;;  %v118_v17 = vld [vmem:[%s365_s3 + $0x28] sm:$0xff]  ;;  %v115_v33 = vld [vmem:[%s365_s3 + $0x10] sm:$0xff] }
   0x5   :  { %35 = vadd.xlane.f32.xlu0 %v34_v4  ;;  %225 = vmatpush3.bf16.msra.mxu0 %v63_v10  ;;  %v123_v18 = vpack.c.bf16 %v118_v17, %v117_v15  ;;  %v212_v28 = vld [vmem:[%s366_s1] ss:$0 sm:$0xff]  ;;  %v116_v34 = vld [vmem:[%s365_s3 + $0x18] sm:$0xff]  ;;  %v114_v37 = vld [vmem:[%s365_s3 + $0x8] sm:$0xff] }
   0x6   :  { %226 = vmatprep.subr.bf16.mxu0 %v254_v6  ;;  %233 = vmatpush3.bf16.msra.mxu1 %v124_v16  ;;  %v122_v35 = vpack.c.bf16 %v116_v34, %v115_v33  ;;  %v113_v36 = vld [vmem:[%s365_s3] sm:$0xff] }
   0x7   :  { %234 = vmatprep.subr.bf16.mxu1 %v254_v6  ;;  %v121_v38 = vpack.c.bf16 %v114_v37, %v113_v36 }
   0x8   :  { %v110_v46 = vld [vmem:[#allocation2] sm:$0xff]  ;;  %v111_v50 = vld [vmem:[#allocation2 + $0x8] sm:$0xff] }
   0x9   :  { %38 = vadd.xlane.f32.xlu0 %v37_v5  ;;  %227 = vmatpush3.bf16.msra.mxu0 %v62_v12 }
   0xa   :  { %235 = vmatpush3.bf16.msra.mxu1 %v123_v18 }
   0xb   :  { %236 = vmatprep.subr.bf16.mxu1 %v254_v6 }
   0xe   :  { %237 = vmatpush3.bf16.msra.mxu1 %v122_v35 }
   0xf   :  { %238 = vmatprep.subr.bf16.mxu1 %v254_v6  ;;  %v215_v6 = vld [vmem:[%s367_s4] ss:$0 sm:$0xff] }
  0x12   :  { %239 = vmatpush3.bf16.msra.mxu1 %v121_v38 }
  0x8e   :  { %v36_v19 = vpop.xlane.xlu0 %35 }
  0x8f   :  { %v41_v20 = vmul.f32 0.03125, %v36_v19 }
  0x91   :  { %v43_v21 = vadd.f32 1e-06, %v41_v20 }
  0x92   :  { %v39_v22 = vpop.xlane.xlu0 %38 }
  0x93   :  { %246 = vrsqrt.f32 %v43_v21  ;;  %v42_v23 = vmul.f32 0.03125, %v39_v22 }
  0x95   :  { %v44_v24 = vadd.f32 1e-06, %v42_v23 }
  0x97   :  { %248 = vrsqrt.f32 %v44_v24 }
  0xa0   :  { %v247_v25 = vpop.eup %246 }
  0xa1   :  { %v47_v26 = vmul.f32 %v247_v25, %v289_v0 }
  0xa3   :  { %v55_v30 = vmul.f32 %v212_v28, %v47_v26 }
  0xa4   :  { %v249_v27 = vpop.eup %248 }
  0xa5   :  { %v48_v29 = vmul.f32 %v249_v27, %v294_v1 }
  0xa7   :  { %v56_v31 = vmul.f32 %v212_v28, %v48_v29 }
  0xa9   :  { %v57_v32 = vpack.c.bf16 %v56_v31, %v55_v30 }
  0xab   :  { %229 = vmatmul.mubr.msk.bf16.vlgmr.msra.gmra.mxu0 %vm25_vm0, %v57_v32 }
 0x16b   :  { %v101_v39 = vpop.f32.mrf.mxu0 }
 0x16c   :  { %v108_v42 = vmax.f32 %v101_v39, 0.0 }
 0x16d   :  { %v230_v40 = vpop.f32.mrf.mxu0 }
 0x16f   :  { %v104_v41 = vpop.f32.mrf.mxu0 }
 0x170   :  { %v109_v43 = vmax.f32 %v104_v41, 0.0 }
 0x171   :  { %v231_v44 = vpop.f32.mrf.mxu0 }
 0x172   :  { %v112_v45 = vpack.c.bf16 %v109_v43, %v108_v42 }
 0x174   :  { %241 = vmatmul.mubr.msk.bf16.vlgmr.msra.gmra.mxu1 %vm125_vm2, %v112_v45 }
 0x234   :  { %v163_v47 = vpop.f32.mrf.mxu1 }
 0x235   :  { %v170_v48 = vadd.f32 %v163_v47, %v110_v46 }
 0x236   :  { %v242_v49 = vpop.f32.mrf.mxu1 }
 0x237   :  { %172 = vst.msk [vmem:[#allocation2] sm:$0xff] %vm25_vm0, %v170_v48 }
 0x238   :  { %v166_v51 = vpop.f32.mrf.mxu1 }
 0x239   :  { %v171_v52 = vadd.f32 %v166_v51, %v111_v50 }
 0x23a   :  { %v243_v53 = vpop.f32.mrf.mxu1 }
 0x23b   :  { %173 = vst.msk [vmem:[#allocation2 + $0x8] sm:$0xff] %vm25_vm0, %v171_v52 }
 0x23e   :  { %v177_v54 = vld [vmem:[#allocation2] sm:$0xff] }
 0x23f   :  { %v179_v55 = vadd.f32 %v177_v54, %v289_v0 }
 0x241   :  { %v182_v56 = vmul.f32 %v179_v55, %v179_v55 }
 0x242   :  { %v178_v57 = vld [vmem:[#allocation2 + $0x8] sm:$0xff] }
 0x243   :  { %v184_v58 = vsel %vm25_vm0, %v182_v56, 0.0  ;;  %v180_v59 = vadd.f32 %v178_v57, %v294_v1 }
 0x244   :  { %185 = vadd.xlane.f32.xlu1 %v184_v58 }
 0x245   :  { %v183_v60 = vmul.f32 %v180_v59, %v180_v59 }
 0x247   :  { %v187_v61 = vsel %vm25_vm0, %v183_v60, 0.0 }
 0x248   :  { %188 = vadd.xlane.f32.xlu1 %v187_v61 }
 0x2cd   :  { %v186_v62 = vpop.xlane.xlu1 %185 }
 0x2ce   :  { %v190_v63 = vmul.f32 0.03125, %v186_v62 }
 0x2d0   :  { %v192_v2 = vadd.f32 1e-06, %v190_v63 }
 0x2d1   :  { %v189_v3 = vpop.xlane.xlu1 %188 }
 0x2d2   :  { %250 = vrsqrt.f32 %v192_v2  ;;  %v191_v4 = vmul.f32 0.03125, %v189_v3 }
 0x2d4   :  { %v193_v5 = vadd.f32 1e-06, %v191_v4 }
 0x2d6   :  { %252 = vrsqrt.f32 %v193_v5 }
 0x2df   :  { %v251_v0 = vpop.eup %250 }
 0x2e0   :  { %v196_v7 = vmul.f32 %v251_v0, %v179_v55 }
 0x2e2   :  { %v204_v1 = vmul.f32 %v215_v6, %v196_v7 }
 0x2e3   :  { %v253_v8 = vpop.eup %252 }
 0x2e4   :  { %206 = vst.msk [vmem:[%s368_s5] sm:$0xff] %vm25_vm0, %v204_v1  ;;  %v197_v9 = vmul.f32 %v253_v8, %v180_v59 }
 0x2e6   :  { %v205_v10 = vmul.f32 %v215_v6, %v197_v9 }
 0x2e8   :  { %207 = vst.msk [vmem:[%s368_s5 + $0x8] sm:$0xff] %vm25_vm0, %v205_v10 }

// kernel: _lambda_.12
= control target key start
LH: loop header
LB: loop body
LE: loop exit
PB: predicated region body
PF: predicated region fallthrough
CT: control target
= control target key end

     0   :  { %vm22_vm0 = vcmask 261120   ;;  %v221_v6 = vmov 0.0   ;;  %vm222_vm1 = vmmov 0   ;;  %vm122_vm2 = vcmask 523264   ;;  %s320_s0 = inlined_call_operand.vmem [shape: f32[16,32], index: 0, kind: input, shape index: {}]   ;;  %s321_s2 = inlined_call_operand.vmem [shape: f32[32,64], index: 2, kind: input, shape index: {}]   ;;  %s322_s3 = inlined_call_operand.vmem [shape: f32[64,32], index: 3, kind: input, shape index: {}]   ;;  %s323_s1 = inlined_call_operand.vmem [shape: f32[1,32], index: 1, kind: input, shape index: {}]   ;;  %s324_s4 = inlined_call_operand.vmem [shape: f32[16,32], index: 4, kind: output, shape index: {}]  }
   0x1   :  { %v251_v0 = vld [vmem:[%s320_s0] sm:$0xff]  ;;  %v256_v1 = vld [vmem:[%s320_s0 + $0x8] sm:$0xff]  ;;  %195 = vmatprep.subr.bf16.mxu0 %v221_v6  ;;  %23 = vst.msk [vmem:[#allocation2] sm:$0xff] %vm22_vm0, %v221_v6  ;;  %24 = vst.msk [vmem:[#allocation2 + $0x8] sm:$0xff] %vm22_vm0, %v221_v6  ;;  %199 = vmatprep.mubr.msk.bf16.mxu0 %vm222_vm1, %v221_v6 }
   0x2   :  { %v28_v2 = vmul.f32 %v251_v0, %v251_v0  ;;  %v29_v3 = vmul.f32 %v256_v1, %v256_v1  ;;  %v57_v7 = vld [vmem:[%s321_s2 + $0x10] sm:$0xff]  ;;  %v58_v8 = vld [vmem:[%s321_s2 + $0x18] sm:$0xff]  ;;  %v55_v9 = vld [vmem:[%s321_s2] sm:$0xff]  ;;  %203 = vmatprep.subr.bf16.mxu1 %v221_v6  ;;  %211 = vmatprep.mubr.msk.bf16.mxu1 %vm222_vm1, %v221_v6 }
   0x3   :  { %v60_v10 = vpack.c.bf16 %v58_v8, %v57_v7  ;;  %v56_v11 = vld [vmem:[%s321_s2 + $0x8] sm:$0xff]  ;;  %v116_v13 = vld [vmem:[%s322_s3 + $0x30] sm:$0xff]  ;;  %v117_v14 = vld [vmem:[%s322_s3 + $0x38] sm:$0xff] }
   0x4   :  { %v31_v4 = vsel %vm22_vm0, %v28_v2, 0.0  ;;  %v34_v5 = vsel %vm22_vm0, %v29_v3, 0.0  ;;  %v59_v12 = vpack.c.bf16 %v56_v11, %v55_v9  ;;  %v114_v15 = vld [vmem:[%s322_s3 + $0x20] sm:$0xff]  ;;  %v121_v16 = vpack.c.bf16 %v117_v14, %v116_v13  ;;  %v115_v17 = vld [vmem:[%s322_s3 + $0x28] sm:$0xff]  ;;  %v112_v33 = vld [vmem:[%s322_s3 + $0x10] sm:$0xff] }
   0x5   :  { %32 = vadd.xlane.f32.xlu0 %v31_v4  ;;  %196 = vmatpush3.bf16.msra.mxu0 %v60_v10  ;;  %v120_v18 = vpack.c.bf16 %v115_v17, %v114_v15  ;;  %v184_v28 = vld [vmem:[%s323_s1] ss:$0 sm:$0xff]  ;;  %v113_v34 = vld [vmem:[%s322_s3 + $0x18] sm:$0xff]  ;;  %v111_v37 = vld [vmem:[%s322_s3 + $0x8] sm:$0xff] }
   0x6   :  { %197 = vmatprep.subr.bf16.mxu0 %v221_v6  ;;  %204 = vmatpush3.bf16.msra.mxu1 %v121_v16  ;;  %v119_v35 = vpack.c.bf16 %v113_v34, %v112_v33  ;;  %v110_v36 = vld [vmem:[%s322_s3] sm:$0xff] }
   0x7   :  { %205 = vmatprep.subr.bf16.mxu1 %v221_v6  ;;  %v118_v38 = vpack.c.bf16 %v111_v37, %v110_v36 }
   0x8   :  { %v107_v46 = vld [vmem:[#allocation2] sm:$0xff]  ;;  %v108_v50 = vld [vmem:[#allocation2 + $0x8] sm:$0xff] }
   0x9   :  { %35 = vadd.xlane.f32.xlu0 %v34_v5  ;;  %198 = vmatpush3.bf16.msra.mxu0 %v59_v12 }
   0xa   :  { %206 = vmatpush3.bf16.msra.mxu1 %v120_v18 }
   0xb   :  { %207 = vmatprep.subr.bf16.mxu1 %v221_v6 }
   0xe   :  { %208 = vmatpush3.bf16.msra.mxu1 %v119_v35 }
   0xf   :  { %209 = vmatprep.subr.bf16.mxu1 %v221_v6 }
  0x12   :  { %210 = vmatpush3.bf16.msra.mxu1 %v118_v38 }
  0x8e   :  { %v33_v19 = vpop.xlane.xlu0 %32 }
  0x8f   :  { %v38_v20 = vmul.f32 0.03125, %v33_v19 }
  0x91   :  { %v40_v21 = vadd.f32 1e-06, %v38_v20 }
  0x92   :  { %v36_v22 = vpop.xlane.xlu0 %35 }
  0x93   :  { %217 = vrsqrt.f32 %v40_v21  ;;  %v39_v23 = vmul.f32 0.03125, %v36_v22 }
  0x95   :  { %v41_v24 = vadd.f32 1e-06, %v39_v23 }
  0x97   :  { %219 = vrsqrt.f32 %v41_v24 }
  0xa0   :  { %v218_v25 = vpop.eup %217 }
  0xa1   :  { %v44_v26 = vmul.f32 %v218_v25, %v251_v0 }
  0xa3   :  { %v52_v30 = vmul.f32 %v184_v28, %v44_v26 }
  0xa4   :  { %v220_v27 = vpop.eup %219 }
  0xa5   :  { %v45_v29 = vmul.f32 %v220_v27, %v256_v1 }
  0xa7   :  { %v53_v31 = vmul.f32 %v184_v28, %v45_v29 }
  0xa9   :  { %v54_v32 = vpack.c.bf16 %v53_v31, %v52_v30 }
  0xab   :  { %200 = vmatmul.mubr.msk.bf16.vlgmr.msra.gmra.mxu0 %vm22_vm0, %v54_v32 }
 0x16b   :  { %v98_v39 = vpop.f32.mrf.mxu0 }
 0x16c   :  { %v105_v42 = vmax.f32 %v98_v39, 0.0 }
 0x16d   :  { %v201_v40 = vpop.f32.mrf.mxu0 }
 0x16f   :  { %v101_v41 = vpop.f32.mrf.mxu0 }
 0x170   :  { %v106_v43 = vmax.f32 %v101_v41, 0.0 }
 0x171   :  { %v202_v44 = vpop.f32.mrf.mxu0 }
 0x172   :  { %v109_v45 = vpack.c.bf16 %v106_v43, %v105_v42 }
 0x174   :  { %212 = vmatmul.mubr.msk.bf16.vlgmr.msra.gmra.mxu1 %vm122_vm2, %v109_v45 }
 0x234   :  { %v160_v47 = vpop.f32.mrf.mxu1 }
 0x235   :  { %v167_v48 = vadd.f32 %v160_v47, %v107_v46 }
 0x236   :  { %v213_v49 = vpop.f32.mrf.mxu1 }
 0x237   :  { %169 = vst.msk [vmem:[#allocation2] sm:$0xff] %vm22_vm0, %v167_v48 }
 0x238   :  { %v163_v51 = vpop.f32.mrf.mxu1 }
 0x239   :  { %v168_v52 = vadd.f32 %v163_v51, %v108_v50 }
 0x23a   :  { %v214_v53 = vpop.f32.mrf.mxu1 }
 0x23b   :  { %170 = vst.msk [vmem:[#allocation2 + $0x8] sm:$0xff] %vm22_vm0, %v168_v52 }
 0x23e   :  { %v174_v54 = vld [vmem:[#allocation2] sm:$0xff] }
 0x23f   :  { %v176_v55 = vadd.f32 %v174_v54, %v251_v0 }
 0x241   :  { %178 = vst.msk [vmem:[%s324_s4] sm:$0xff] %vm22_vm0, %v176_v55 }
 0x242   :  { %v175_v56 = vld [vmem:[#allocation2 + $0x8] sm:$0xff] }
 0x243   :  { %v177_v57 = vadd.f32 %v175_v56, %v256_v1 }
 0x245   :  { %179 = vst.msk [vmem:[%s324_s4 + $0x8] sm:$0xff] %vm22_vm0, %v177_v57 }

// kernel: _lambda_.11
= control target key start
LH: loop header
LB: loop body
LE: loop exit
PB: predicated region body
PF: predicated region fallthrough
CT: control target
= control target key end

     0   :  { %s1976_s27 = smov 0   ;;  %s1978_s28 = smov 0   ;;  %s2260_s0 = inlined_call_operand.vmem [shape: f32[2,8,32], index: 0, kind: input, shape index: {}, may-alias: {0,1}]   ;;  %s2261_s1 = inlined_call_operand.vmem [shape: f32[2,8,32], index: 1, kind: input, shape index: {}, may-alias: {0,1}]   ;;  %s2262_s2 = inlined_call_operand.vmem [shape: f32[1,32], index: 2, kind: input, shape index: {}]   ;;  %s2263_s3 = inlined_call_operand.vmem [shape: f32[32,32], index: 3, kind: input, shape index: {}]   ;;  %s2264_s4 = inlined_call_operand.vmem [shape: f32[32,64], index: 4, kind: input, shape index: {}]   ;;  %s2265_s5 = inlined_call_operand.vmem [shape: f32[32,32], index: 5, kind: input, shape index: {}]   ;;  %s2266_s6 = inlined_call_operand.vmem [shape: f32[1,4,8,8], index: 6, kind: input, shape index: {}]   ;;  %s2267_s7 = inlined_call_operand.vmem [shape: f32[2,1,8], index: 7, kind: input, shape index: {}]   ;;  %s2268_s8 = inlined_call_operand.vmem [shape: f32[2,8,32], index: 8, kind: output, shape index: {}]  }
   0x1   :  { %s1980_s29 = smov 0  }
   0x2 LB: > { %s30_s30 = sadd.s32 1, %s1914_s28  ;;  %p1718_p0 = scmp.ge.s32.totalorder %s1918_s29, 1  ;;  %s1918_s29 = sphi %s1980_s29, %s18_s29   ;;  %s1914_s28 = sphi %s1978_s28, %s2270_s28   ;;  %s1910_s27 = sphi %s1976_s27, %s2269_s27  }
   0x3   : > { %p32_p1 = scmp.ge.s32.totalorder %s30_s30, 2  ;;  %p306_p2 = scmp.lt.s32.totalorder %s1918_s29, 3 }
   0x5   : > { %s2272_s30 = smov (%p32_p1, %s30_s30), 0  ;;  %p307_p3 = pnand %p1718_p0, %p306_p2 }
   0x6   : > { %p355_p4 = scmp.lt.s32.totalorder (!%p307_p3), %s1910_s27, 1  ;;  %s1922_s17 = smov (!%p307_p3), 120  }
   0x7   : > { %310 = sbr.rel (%p307_p3) target bundleno = 1622 (0x656), region = 52  ;;  %s1923_s18 = smov (!%p307_p3), 104  }
   0x8   : > { %s1924_s19 = smov (!%p307_p3), 112   ;;  %s1927_s13 = smov (!%p307_p3), 96  }
   0x9   : > { %s1929_s23 = smov (!%p307_p3), 8   ;;  %s1930_s24 = smov (!%p307_p3), 24  }
   0xc   : > { %s2274_s27 = smov (!%p355_p4, %s1910_s27), 1  ;;  %vm402_vm0 = vcmask 261120   ;;  %v390_v6 = vld [vmem:[%s2264_s4 + $0x10] sm:$0xff]  ;;  %v391_v7 = vld [vmem:[%s2264_s4 + $0x18] sm:$0xff]  ;;  %v1920_v9 = vmov 0.0   ;;  %v388_v12 = vld [vmem:[%s2264_s4] sm:$0xff]  ;;  %v534_v44 = vlaneseq }
   0xd   : > { %s1997_s9 = sshll.u32 %s2274_s27, 3  ;;  %v386_v8 = vld [vmem:[%s2263_s3 + $0x10] sm:$0xff]  ;;  %1777 = vmatprep.subr.bf16.mxu1 %v1920_v9  ;;  %v475_v10 = vpack.c.bf16 %v391_v7, %v390_v6  ;;  %1769 = vmatprep.subr.bf16.mxu0 %v1920_v9  ;;  %v387_v11 = vld [vmem:[%s2263_s3 + $0x18] sm:$0xff]  ;;  %v389_v13 = vld [vmem:[%s2264_s4 + $0x8] sm:$0xff]  ;;  %vm1921_vm1 = vmmov 0   ;;  %vm967_vm2 = vcmask 64512   ;;  %s372_s22 = scalar_lea.vmem %s2267_s7, %s2274_s27 }
   0xe   : > { %s365_s12 = scalar_lea.vmem %s2261_s1, %s1997_s9  ;;  %s361_s15 = scalar_lea.vmem %s2260_s0, %s1997_s9  ;;  %v429_v14 = vpack.c.bf16 %v387_v11, %v386_v8  ;;  %1781 = vmatprep.mubr.msk.bf16.mxu1 %vm1921_vm1, %v1920_v9  ;;  %1773 = vmatprep.mubr.msk.bf16.mxu0 %vm1921_vm1, %v1920_v9  ;;  %v474_v15 = vpack.c.bf16 %v389_v13, %v388_v12  ;;  %v384_v16 = vld [vmem:[%s2263_s3] sm:$0xff]  ;;  %v385_v17 = vld [vmem:[%s2263_s3 + $0x8] sm:$0xff]  ;;  %v1925_v42 = vmov 1983009808   ;;  %v1926_v45 = vmov 1934713408  }
   0xf   : > { %v382_v0 = vld [vmem:[%s365_s12] sm:$0xff]  ;;  %1778 = vmatpush3.bf16.msra.mxu1 %v475_v10  ;;  %v428_v18 = vpack.c.bf16 %v385_v17, %v384_v16  ;;  %v532_v43 = vunpack.c.l.s4 %v1925_v42  ;;  %v564_v46 = vunpack.c.l.s4 %v1926_v45  ;;  %v2062_v48 = vshrl.u32 %v534_v44, 7  ;;  %s379_s27 = scalar_lea.vmem %s2268_s8, %s1997_s9 }
  0x10   : > { %v2007_v1 = vld [vmem:[%s361_s15] sm:$0xff]  ;;  %v418_v2 = vmul.f32 %v382_v0, %v382_v0  ;;  %1779 = vmatprep.subr.bf16.mxu1 %v1920_v9  ;;  %1770 = vmatpush3.bf16.msra.mxu0 %v429_v14  ;;  %vm1219_vm3 = vcmask 1043456   ;;  %vm1550_vm4 = vcmask 130048   ;;  %vm1552_vm5 = vcmask 195584  }
  0x11   : > { %v401_v3 = vmul.f32 %v2007_v1, %v2007_v1  ;;  %1771 = vmatprep.subr.bf16.mxu0 %v1920_v9  ;;  %v1722_v26 = vld [vmem:[%s2262_s2] ss:$0 sm:$0xff]  ;;  %v533_v47 = vunpack.c.0.s8 %v532_v43  ;;  %v565_v51 = vunpack.c.0.s8 %v564_v46 }
  0x12   : > { %v419_v4 = vsel %vm402_vm0, %v418_v2, 0.0 }
  0x13   : > { %420 = vadd.xlane.f32.xlu0 %v419_v4  ;;  %v403_v5 = vsel %vm402_vm0, %v401_v3, 0.0  ;;  %1780 = vmatpush3.bf16.msra.mxu1 %v474_v15  ;;  %v2069_v52 = vsub.s32 %v533_v47, %v2062_v48  ;;  %v2082_v58 = vsub.s32 %v565_v51, %v2062_v48 }
  0x14   : > { %1791 = vmatprep.subr.bf16.mxu1 %v1920_v9  ;;  %1772 = vmatpush3.bf16.msra.mxu0 %v428_v18 }
  0x15   : > { %1785 = vmatprep.subr.bf16.mxu0 %v1920_v9 }
  0x17   : > { %404 = vadd.xlane.f32.xlu0 %v403_v5 }
  0x9c   : > { %v421_v19 = vpop.xlane.xlu0 %420 }
  0x9d   : > { %v422_v20 = vmul.f32 0.03125, %v421_v19 }
  0x9f   : > { %v423_v21 = vadd.f32 1e-06, %v422_v20 }
  0xa0   : > { %v405_v22 = vpop.xlane.xlu0 %404 }
  0xa1   : > { %1876 = vrsqrt.f32 %v423_v21  ;;  %v407_v23 = vmul.f32 0.03125, %v405_v22 }
  0xa3   : > { %v408_v24 = vadd.f32 1e-06, %v407_v23 }
  0xa5   : > { %1878 = vrsqrt.f32 %v408_v24 }
  0xae   : > { %v1877_v25 = vpop.eup %1876 }
  0xaf   : > { %v425_v27 = vmul.f32 %v1877_v25, %v382_v0 }
  0xb1   : > { %v426_v28 = vmul.f32 %v1722_v26, %v425_v27 }
  0xb2   : > { %v1879_v29 = vpop.eup %1878 }
  0xb3   : > { %v473_v30 = vpack.c.bf16 %v426_v28, %v426_v28  ;;  %v410_v31 = vmul.f32 %v1879_v29, %v2007_v1 }
  0xb5   : > { %1782 = vmatmul.mubr.msk.bf16.vlgmr.msra.gmra.mxu1 %vm402_vm0, %v473_v30  ;;  %v417_v32 = vmul.f32 %v1722_v26, %v410_v31 }
  0xb6   : > { %1793 = vmatprep.mubr.msk.bf16.mxu1 %vm1921_vm1, %v1920_v9 }
  0xb7   : > { %v427_v33 = vpack.c.bf16 %v417_v32, %v417_v32 }
  0xb9   : > { %1774 = vmatmul.mubr.msk.bf16.vlgmr.msra.gmra.mxu0 %vm402_vm0, %v427_v33 }
  0xba   : > { %1787 = vmatprep.mubr.msk.bf16.mxu0 %vm1921_vm1, %v1920_v9 }
 0x175   : > { %v2057_v34 = vpop.f32.mrf.mxu1 }
 0x176   : > { %666 = vrot.lane.b32.xlu1 %v2057_v34, %s1922_s17  ;;  %672 = vrot.lane.b32.xlu0 %v2057_v34, %s1923_s18 }
 0x177   : > { %v1783_v35 = vpop.f32.mrf.mxu1 }
 0x179   : > { %v467_v36 = vpop.f32.mrf.mxu0  ;;  %v516_v37 = vpop.f32.mrf.mxu1 }
 0x17a   : > { %669 = vrot.lane.b32.xlu1 %v2057_v34, %s1924_s19 }
 0x17b   : > { %v1775_v38 = vpop.f32.mrf.mxu0  ;;  %v1784_v39 = vpop.f32.mrf.mxu1 }
 0x17d   : > { %v470_v40 = vpop.f32.mrf.mxu0 }
 0x17e   : > { %520 = vrot.lane.b32.xlu1 %v467_v36, %s1922_s17 }
 0x17f   : > { %v1776_v41 = vpop.f32.mrf.mxu0 }
 0x182   : > { %523 = vrot.lane.b32.xlu1 %v467_v36, %s1924_s19 }
 0x186   : > { %526 = vrot.lane.b32.xlu1 %v467_v36, %s1923_s18 }
 0x1e8   : > { %v2064_v49 = vpop.permute.xlu1 %666  ;;  %v2066_v50 = vpop.permute.xlu0 %672 }
 0x1e9   : > { %v691_v53 = vcombine.low %v2064_v49, %v2066_v50  ;;  %v692_v54 = vcombine.high %v2064_v49, %v2066_v50 }
 0x1eb   : > { %v699_v59 = vrot.slane %v691_v53, %v2069_v52  ;;  %v706_v60 = vrot.slane %v692_v54, %v2069_v52 }
 0x1ec   : > { %v2075_v55 = vpop.permute.xlu1 %669 }
 0x1ed   : > { %v675_v56 = vcombine.low %v2057_v34, %v2075_v55  ;;  %v676_v57 = vcombine.high %v2057_v34, %v2075_v55 }
 0x1ef   : > { %v683_v61 = vrot.slane %v675_v56, %v2069_v52  ;;  %v690_v62 = vrot.slane %v676_v57, %v2069_v52 }
 0x1f0   : > { %v521_v63 = vpop.permute.xlu1 %520 }
 0x1f1   : > { %v707_v0 = vcombine.low %v683_v61, %v699_v59  ;;  %v708_v2 = vcombine.high %v683_v61, %v699_v59  ;;  %v723_v3 = vcombine.low %v690_v62, %v706_v60  ;;  %v724_v4 = vcombine.high %v690_v62, %v706_v60 }
 0x1f3   : > { %v715_v5 = vrot.slane %v707_v0, %v2082_v58  ;;  %v722_v6 = vrot.slane %v708_v2, %v2082_v58  ;;  %v731_v7 = vrot.slane %v723_v3, %v2082_v58  ;;  %v738_v8 = vrot.slane %v724_v4, %v2082_v58 }
 0x1f4   : > { %v524_v10 = vpop.permute.xlu1 %523 }
 0x1f5   : > { %v743_v11 = vcombine.low %v715_v5, %v722_v6  ;;  %v1727_v12 = vcombine.high %v715_v5, %v722_v6  ;;  %v759_v13 = vcombine.low %v731_v7, %v738_v8  ;;  %v1728_v14 = vcombine.high %v731_v7, %v738_v8 }
 0x1f6   : > { %v529_v15 = vcombine.low %v467_v36, %v524_v10  ;;  %v530_v16 = vcombine.high %v467_v36, %v524_v10 }
 0x1f7   : > { %v750_v17 = vrot.slane %v743_v11, %v2069_v52  ;;  %v758_v18 = vrot.slane %v1727_v12, %v2069_v52  ;;  %v766_v19 = vrot.slane %v759_v13, %v2069_v52  ;;  %v774_v20 = vrot.slane %v1728_v14, %v2069_v52 }
 0x1f8   : > { %v527_v21 = vpop.permute.xlu1 %526  ;;  %v537_v26 = vrot.slane %v529_v15, %v2069_v52  ;;  %v544_v27 = vrot.slane %v530_v16, %v2069_v52 }
 0x1f9   : > { %v545_v22 = vcombine.low %v521_v63, %v527_v21  ;;  %v546_v23 = vcombine.high %v521_v63, %v527_v21  ;;  %v775_v24 = vcombine.low %v750_v17, %v758_v18  ;;  %v791_v25 = vcombine.low %v766_v19, %v774_v20 }
 0x1fa   : > { %v776_v32 = vcombine.high %v750_v17, %v758_v18  ;;  %v792_v33 = vcombine.high %v766_v19, %v774_v20 }
 0x1fb   : > { %v553_v28 = vrot.slane %v545_v22, %v2069_v52  ;;  %v560_v29 = vrot.slane %v546_v23, %v2069_v52  ;;  %v783_v30 = vrot.slane %v775_v24, %v2082_v58  ;;  %v799_v31 = vrot.slane %v791_v25, %v2082_v58  ;;  %v400_v25 = vld [vmem:[%s372_s22] sm:$0x1]  ;;  %s1928_s22 = smov 16  }
 0x1fc   : > { %v790_v47 = vrot.slane %v776_v32, %v2082_v58  ;;  %v806_v51 = vrot.slane %v792_v33, %v2082_v58 }
 0x1fd   : > { %v561_v35 = vcombine.low %v537_v26, %v553_v28  ;;  %v562_v36 = vcombine.high %v537_v26, %v553_v28  ;;  %v577_v37 = vcombine.low %v544_v27, %v560_v29  ;;  %v578_v38 = vcombine.high %v544_v27, %v560_v29  ;;  %v396_v29 = vld [vmem:[%s2266_s6] sm:$0xff] }
 0x1fe   : > { %v807_v39 = vcombine.low %v783_v30, %v799_v31  ;;  %v808_v40 = vcombine.high %v783_v30, %v799_v31  ;;  %v809_v4 = vcombine.low %v790_v47, %v806_v51  ;;  %v810_v5 = vcombine.high %v790_v47, %v806_v51  ;;  %v397_v30 = vld [vmem:[%s2266_s6 + $0x8] sm:$0xff]  ;;  %v399_v47 = vld [vmem:[%s2266_s6 + $0x18] sm:$0xff] }
 0x1ff   : > { %v569_v41 = vrot.slane %v561_v35, %v2082_v58  ;;  %v576_v42 = vrot.slane %v562_v36, %v2082_v58  ;;  %v585_v43 = vrot.slane %v577_v37, %v2082_v58  ;;  %v592_v44 = vrot.slane %v578_v38, %v2082_v58 }
 0x200   : > { %v963_v45 = vpack.c.bf16 %v807_v39, %v807_v39  ;;  %v964_v46 = vpack.c.bf16 %v808_v40, %v808_v40  ;;  %v965_v13 = vpack.c.bf16 %v809_v4, %v809_v4  ;;  %v966_v14 = vpack.c.bf16 %v810_v5, %v810_v5 }
 0x201   : > { %v597_v53 = vcombine.low %v569_v41, %v576_v42  ;;  %v1725_v54 = vcombine.high %v569_v41, %v576_v42  ;;  %v613_v56 = vcombine.low %v585_v43, %v592_v44  ;;  %v1726_v57 = vcombine.high %v585_v43, %v592_v44 }
 0x202   : > { %v972_v59 = vsel %vm967_vm2, %v963_v45, 0  ;;  %v1018_v60 = vsel %vm967_vm2, %v964_v46, 0  ;;  %v1064_v19 = vsel %vm967_vm2, %v965_v13, 0  ;;  %v1110_v20 = vsel %vm967_vm2, %v966_v14, 0  ;;  %v398_v46 = vld [vmem:[%s2266_s6 + $0x10] sm:$0xff] }
 0x203   : > { %v604_v61 = vrot.slane %v597_v53, %v2069_v52  ;;  %v612_v62 = vrot.slane %v1725_v54, %v2069_v52  ;;  %v620_v63 = vrot.slane %v613_v56, %v2069_v52  ;;  %v628_v0 = vrot.slane %v1726_v57, %v2069_v52  ;;  %1786 = vmatpush3.bf16.xpose.msra.mxu0 %v972_v59 }
 0x204   : > { %1792 = vmatpush3.bf16.xpose.msra.mxu1 %v1018_v60  ;;  %1797 = vmatprep.subr.bf16.mxu0 %v1920_v9  ;;  %v1152_v26 = vsub.f32 1.0, %v400_v25  ;;  %v1157_v28 = vsub.s32 0, %v2062_v48 }
 0x205   : > { %v629_v2 = vcombine.low %v604_v61, %v612_v62  ;;  %v645_v3 = vcombine.low %v620_v63, %v628_v0  ;;  %1803 = vmatprep.subr.bf16.mxu1 %v1920_v9  ;;  %v630_v6 = vcombine.high %v604_v61, %v612_v62  ;;  %v646_v7 = vcombine.high %v620_v63, %v628_v0 }
 0x206   : > { %v1153_v27 = vmul.f32 -1e+09, %v1152_v26 }
 0x207   : > { %v637_v8 = vrot.slane %v629_v2, %v2082_v58  ;;  %v653_v10 = vrot.slane %v645_v3, %v2082_v58  ;;  %v644_v17 = vrot.slane %v630_v6, %v2082_v58  ;;  %v660_v18 = vrot.slane %v646_v7, %v2082_v58 }
 0x208   : > { %v1158_v31 = vrot.slane %v1153_v27, %v1157_v28 }
 0x209   : > { %v661_v11 = vcombine.low %v637_v8, %v653_v10  ;;  %v662_v12 = vcombine.high %v637_v8, %v653_v10  ;;  %v663_v21 = vcombine.low %v644_v17, %v660_v18  ;;  %v664_v22 = vcombine.high %v644_v17, %v660_v18 }
 0x20b   : > { %v959_v15 = vpack.c.bf16 %v661_v11, %v661_v11  ;;  %v960_v16 = vpack.c.bf16 %v662_v12, %v662_v12  ;;  %v961_v23 = vpack.c.bf16 %v663_v21, %v663_v21  ;;  %v962_v24 = vpack.c.bf16 %v664_v22, %v664_v22 }
 0x20d   : > { %1788 = vmatmul.mubr.msk.bf16.vlgmr.msra.gmra.mxu0 %vm967_vm2, %v959_v15  ;;  %1794 = vmatmul.mubr.msk.bf16.vlgmr.msra.gmra.mxu1 %vm967_vm2, %v960_v16 }
 0x20e   : > { %1798 = vmatpush3.bf16.xpose.msra.mxu0 %v1064_v19  ;;  %1804 = vmatpush3.bf16.xpose.msra.mxu1 %v1110_v20 }
 0x20f   : > { %1799 = vmatprep.mubr.msk.bf16.mxu0 %vm1921_vm1, %v1920_v9  ;;  %1805 = vmatprep.mubr.msk.bf16.mxu1 %vm1921_vm1, %v1920_v9 }
 0x210   : > { %1809 = vmatprep.subr.bf16.mxu0 %v1920_v9  ;;  %1815 = vmatprep.subr.bf16.mxu1 %v1920_v9 }
 0x215   : > { %1800 = vmatmul.mubr.msk.bf16.vlgmr.msra.gmra.mxu0 %vm967_vm2, %v961_v23  ;;  %1806 = vmatmul.mubr.msk.bf16.vlgmr.msra.gmra.mxu1 %vm967_vm2, %v962_v24 }
 0x216   : > { %1811 = vmatprep.mubr.msk.bf16.mxu0 %vm1921_vm1, %v1920_v9  ;;  %1817 = vmatprep.mubr.msk.bf16.mxu1 %vm1921_vm1, %v1920_v9 }
 0x2cd   : > { %v1008_v32 = vpop.f32.mrf.mxu0  ;;  %v1054_v33 = vpop.f32.mrf.mxu1 }
 0x2ce   : > { %v1009_v35 = vadd.f32 %v1008_v32, %v396_v29  ;;  %v1055_v36 = vadd.f32 %v1054_v33, %v397_v30 }
 0x2cf   : > { %v1789_v37 = vpop.f32.mrf.mxu0  ;;  %v1795_v38 = vpop.f32.mrf.mxu1 }
 0x2d0   : > { %v1161_v39 = vadd.f32 %v1158_v31, %v1055_v36  ;;  %v1160_v40 = vadd.f32 %v1158_v31, %v1009_v35 }
 0x2d1   : > { %v1011_v41 = vpop.f32.mrf.mxu0  ;;  %v1057_v42 = vpop.f32.mrf.mxu1 }
 0x2d2   : > { %v1167_v48 = vsel %vm967_vm2, %v1161_v39, -inf  ;;  %v1164_v43 = vsel %vm967_vm2, %v1160_v40, -inf }
 0x2d3   : > { %1168 = vmax.xlane.f32.xlu0 %v1167_v48  ;;  %v1796_v44 = vpop.f32.mrf.mxu1  ;;  %1165 = vmax.xlane.f32.xlu1 %v1164_v43  ;;  %v1790_v45 = vpop.f32.mrf.mxu0 }
 0x2d5   : > { %v1100_v51 = vpop.f32.mrf.mxu0  ;;  %v1146_v53 = vpop.f32.mrf.mxu1 }
 0x2d6   : > { %v1101_v54 = vadd.f32 %v1100_v51, %v398_v46  ;;  %v1147_v56 = vadd.f32 %v1146_v53, %v399_v47 }
 0x2d7   : > { %v1801_v57 = vpop.f32.mrf.mxu0  ;;  %v1807_v59 = vpop.f32.mrf.mxu1 }
 0x2d8   : > { %v1162_v60 = vadd.f32 %v1158_v31, %v1101_v54  ;;  %v1163_v0 = vadd.f32 %v1158_v31, %v1147_v56 }
 0x2d9   : > { %v1103_v61 = vpop.f32.mrf.mxu0  ;;  %v1149_v62 = vpop.f32.mrf.mxu1 }
 0x2da   : > { %v1170_v63 = vsel %vm967_vm2, %v1162_v60, -inf  ;;  %v1173_v4 = vsel %vm967_vm2, %v1163_v0, -inf }
 0x2db   : > { %v1808_v2 = vpop.f32.mrf.mxu1  ;;  %1171 = vmax.xlane.f32.xlu1 %v1170_v63  ;;  %v1802_v3 = vpop.f32.mrf.mxu0 }
 0x2df   : > { %1174 = vmax.xlane.f32.xlu1 %v1173_v4 }
 0x2e9   : > { %811 = vrot.lane.b32.xlu0 %v2057_v34, %s1927_s13 }
 0x2f0   : > { %813 = vrot.lane.b32.xlu1 %v2064_v49, %s1927_s13 }
 0x35c   : > { %v1169_v5 = vpop.xlane.xlu0 %1168  ;;  %v1166_v6 = vpop.xlane.xlu1 %1165 }
 0x35d   : > { %v1177_v7 = vsub.f32 %v1161_v39, %v1169_v5  ;;  %v1176_v8 = vsub.f32 %v1160_v40, %v1166_v6 }
 0x35f   : > { %v1182_v10 = vmul.f32 1.442695, %v1177_v7  ;;  %v1180_v11 = vmul.f32 1.442695, %v1176_v8 }
 0x360   : > { %v812_v23 = vpop.permute.xlu0 %811 }
 0x361   : > { %1880 = vpow2.f32 %v1182_v10 }
 0x362   : > { %1882 = vpow2.f32 %v1180_v11 }
 0x364   : > { %v1172_v49 = vpop.xlane.xlu1 %1171 }
 0x365   : > { %v1178_v16 = vsub.f32 %v1162_v60, %v1172_v49 }
 0x367   : > { %v1184_v18 = vmul.f32 1.442695, %v1178_v16 }
 0x368   : > { %v1175_v15 = vpop.xlane.xlu1 %1174 }
 0x369   : > { %v1179_v17 = vsub.f32 %v1163_v0, %v1175_v15  ;;  %1884 = vpow2.f32 %v1184_v18 }
 0x36b   : > { %v1186_v19 = vmul.f32 1.442695, %v1179_v17 }
 0x36d   : > { %1886 = vpow2.f32 %v1186_v19 }
 0x36e   : > { %v2159_v12 = vpop.eup %1880 }
 0x36f   : > { %v2161_v13 = vpop.eup %1882  ;;  %v1191_v14 = vsel %vm967_vm2, %v2159_v12, 0.0 }
 0x370   : > { %v1188_v34 = vsel %vm967_vm2, %v2161_v13, 0.0  ;;  %1192 = vadd.xlane.f32.xlu1 %v1191_v14 }
 0x371   : > { %1189 = vadd.xlane.f32.xlu0 %v1188_v34 }
 0x376   : > { %v2169_v20 = vpop.eup %1884 }
 0x377   : > { %v1194_v22 = vsel %vm967_vm2, %v2169_v20, 0.0 }
 0x37a   : > { %v2171_v21 = vpop.eup %1886 }
 0x381   : > { %815 = vrot.lane.b32.xlu1 %v2075_v55, %s1927_s13  ;;  %v1197_v55 = vsel %vm967_vm2, %v2171_v21, 0.0 }
 0x387   : > { %817 = vrot.lane.b32.xlu0 %v2066_v50, %s1927_s13  ;;  %v814_v50 = vpop.permute.xlu1 %813 }
 0x3a5   : > { %1195 = vadd.xlane.f32.xlu1 %v1194_v22 }
 0x3a6   : > { %1198 = vadd.xlane.f32.xlu0 %v1197_v55 }
 0x3f9   : > { %v1193_v24 = vpop.xlane.xlu1 %1192 }
 0x3fa   : > { %v1190_v25 = vpop.xlane.xlu0 %1189  ;;  %1888 = vrcp.f32 %v1193_v24 }
 0x3fb   : > { %1890 = vrcp.f32 %v1190_v25 }
 0x3fd   : > { %v816_v26 = vpop.permute.xlu1 %815 }
 0x3fe   : > { %v818_v27 = vpop.permute.xlu0 %817  ;;  %v823_v28 = vcombine.low %v812_v23, %v816_v26  ;;  %v824_v29 = vcombine.high %v812_v23, %v816_v26 }
 0x3ff   : > { %v839_v30 = vcombine.low %v814_v50, %v818_v27  ;;  %v840_v31 = vcombine.high %v814_v50, %v818_v27 }
 0x400   : > { %v831_v32 = vrot.slane %v823_v28, %v2069_v52  ;;  %v838_v33 = vrot.slane %v824_v29, %v2069_v52  ;;  %v394_v28 = vld [vmem:[%s2265_s5 + $0x10] sm:$0xff]  ;;  %v395_v29 = vld [vmem:[%s2265_s5 + $0x18] sm:$0xff] }
 0x401   : > { %v847_v35 = vrot.slane %v839_v30, %v2069_v52  ;;  %v854_v36 = vrot.slane %v840_v31, %v2069_v52 }
 0x403   : > { %v855_v37 = vcombine.low %v831_v32, %v847_v35  ;;  %v856_v38 = vcombine.high %v831_v32, %v847_v35  ;;  %v871_v39 = vcombine.low %v838_v33, %v854_v36  ;;  %v872_v40 = vcombine.high %v838_v33, %v854_v36 }
 0x405   : > { %v863_v41 = vrot.slane %v855_v37, %v2082_v58  ;;  %v870_v42 = vrot.slane %v856_v38, %v2082_v58  ;;  %v879_v48 = vrot.slane %v871_v39, %v2082_v58  ;;  %v886_v43 = vrot.slane %v872_v40, %v2082_v58 }
 0x407   : > { %v891_v44 = vcombine.low %v863_v41, %v870_v42  ;;  %v1729_v45 = vcombine.high %v863_v41, %v870_v42  ;;  %v907_v46 = vcombine.low %v879_v48, %v886_v43  ;;  %v1730_v47 = vcombine.high %v879_v48, %v886_v43  ;;  %v1889_v62 = vpop.eup %1888 }
 0x408   : > { %v1891_v4 = vpop.eup %1890  ;;  %v1203_v34 = vmul.f32 %v1889_v62, %v2159_v12  ;;  %v392_v62 = vld [vmem:[%s2265_s5] sm:$0xff] }
 0x409   : > { %v898_v51 = vrot.slane %v891_v44, %v2069_v52  ;;  %v906_v53 = vrot.slane %v1729_v45, %v2069_v52  ;;  %v914_v54 = vrot.slane %v907_v46, %v2069_v52  ;;  %v922_v56 = vrot.slane %v1730_v47, %v2069_v52 }
 0x40a   : > { %v1201_v14 = vmul.f32 %v1891_v4, %v2161_v13  ;;  %v1209_v19 = vpack.c.bf16 %v1203_v34, %v1203_v34 }
 0x40b   : > { %v923_v57 = vcombine.low %v898_v51, %v906_v53  ;;  %v939_v59 = vcombine.low %v914_v54, %v922_v56  ;;  %v924_v60 = vcombine.high %v898_v51, %v906_v53  ;;  %v940_v61 = vcombine.high %v914_v54, %v922_v56 }
 0x40c   : > { %v1208_v18 = vpack.c.bf16 %v1201_v14, %v1201_v14 }
 0x40d   : > { %v931_v63 = vrot.slane %v923_v57, %v2082_v58  ;;  %v947_v0 = vrot.slane %v939_v59, %v2082_v58  ;;  %v938_v2 = vrot.slane %v924_v60, %v2082_v58  ;;  %v954_v3 = vrot.slane %v940_v61, %v2082_v58 }
 0x40f   : > { %v955_v5 = vcombine.low %v931_v63, %v947_v0  ;;  %v956_v6 = vcombine.high %v931_v63, %v947_v0  ;;  %v957_v7 = vcombine.low %v938_v2, %v954_v3  ;;  %v958_v8 = vcombine.high %v938_v2, %v954_v3  ;;  %v393_v63 = vld [vmem:[%s2265_s5 + $0x8] sm:$0xff] }
 0x411   : > { %v1212_v10 = vpack.c.bf16 %v955_v5, %v955_v5  ;;  %v1213_v11 = vpack.c.bf16 %v956_v6, %v956_v6  ;;  %v1214_v16 = vpack.c.bf16 %v957_v7, %v957_v7  ;;  %v1215_v17 = vpack.c.bf16 %v958_v8, %v958_v8 }
 0x412   : > { %v1555_v5 = vpack.c.bf16 %v393_v63, %v392_v62 }
 0x413   : > { %v1221_v49 = vsel %vm1219_vm3, %v1212_v10, 0  ;;  %v1267_v15 = vsel %vm1219_vm3, %v1213_v11, 0  ;;  %v1313_v12 = vsel %vm1219_vm3, %v1214_v16, 0  ;;  %v1359_v13 = vsel %vm1219_vm3, %v1215_v17, 0 }
 0x414   : > { %1810 = vmatpush3.bf16.msra.mxu0 %v1221_v49  ;;  %1816 = vmatpush3.bf16.msra.mxu1 %v1267_v15 }
 0x415   : > { %1821 = vmatprep.subr.bf16.mxu0 %v1920_v9  ;;  %1827 = vmatprep.subr.bf16.mxu1 %v1920_v9 }
 0x417   : > { %1812 = vmatmul.mubr.msk.bf16.vlgmr.msra.gmra.mxu0 %vm967_vm2, %v1208_v18  ;;  %1818 = vmatmul.mubr.msk.bf16.vlgmr.msra.gmra.mxu1 %vm967_vm2, %v1209_v19 }
 0x418   : > { %1822 = vmatpush3.bf16.msra.mxu0 %v1313_v12  ;;  %1828 = vmatpush3.bf16.msra.mxu1 %v1359_v13 }
 0x419   : > { %1823 = vmatprep.mubr.msk.bf16.mxu0 %vm1921_vm1, %v1920_v9  ;;  %1829 = vmatprep.mubr.msk.bf16.mxu1 %vm1921_vm1, %v1920_v9 }
 0x41a   : > { %1833 = vmatprep.subr.bf16.mxu0 %v1920_v9 }
 0x42e   : > { %v1196_v22 = vpop.xlane.xlu1 %1195 }
 0x42f   : > { %v1199_v55 = vpop.xlane.xlu0 %1198  ;;  %1892 = vrcp.f32 %v1196_v22 }
 0x430   : > { %1894 = vrcp.f32 %v1199_v55 }
 0x43c   : > { %v1893_v50 = vpop.eup %1892 }
 0x43d   : > { %v1895_v23 = vpop.eup %1894  ;;  %v1205_v24 = vmul.f32 %v1893_v50, %v2169_v20  ;;  %v1556_v20 = vpack.c.bf16 %v395_v29, %v394_v28 }
 0x43e   : > { %v1207_v25 = vmul.f32 %v1895_v23, %v2171_v21 }
 0x43f   : > { %v1210_v26 = vpack.c.bf16 %v1205_v24, %v1205_v24 }
 0x440   : > { %v1211_v27 = vpack.c.bf16 %v1207_v25, %v1207_v25 }
 0x441   : > { %1824 = vmatmul.mubr.msk.bf16.vlgmr.msra.gmra.mxu0 %vm967_vm2, %v1210_v26 }
 0x442   : > { %1830 = vmatmul.mubr.msk.bf16.vlgmr.msra.gmra.mxu1 %vm967_vm2, %v1211_v27  ;;  %1837 = vmatprep.mubr.msk.bf16.mxu0 %vm1921_vm1, %v1920_v9 }
 0x443   : > { %1834 = vmatpush3.bf16.msra.mxu0 %v1556_v20 }
 0x444   : > { %1835 = vmatprep.subr.bf16.mxu0 %v1920_v9 }
 0x447   : > { %1836 = vmatpush3.bf16.msra.mxu0 %v1555_v5 }
 0x4d7   : > { %v1257_v21 = vpop.f32.mrf.mxu0  ;;  %v1303_v30 = vpop.f32.mrf.mxu1 }
 0x4d9   : > { %v1813_v31 = vpop.f32.mrf.mxu0  ;;  %v1819_v32 = vpop.f32.mrf.mxu1 }
 0x4db   : > { %v1260_v33 = vpop.f32.mrf.mxu0  ;;  %v1306_v35 = vpop.f32.mrf.mxu1 }
 0x4dd   : > { %v1814_v36 = vpop.f32.mrf.mxu0  ;;  %v1820_v37 = vpop.f32.mrf.mxu1 }
 0x501   : > { %v1349_v38 = vpop.f32.mrf.mxu0 }
 0x502   : > { %v1401_v39 = vcombine.low %v1257_v21, %v1349_v38  ;;  %v1402_v40 = vcombine.high %v1257_v21, %v1349_v38  ;;  %v1395_v41 = vpop.f32.mrf.mxu1 }
 0x503   : > { %v1417_v42 = vcombine.low %v1303_v30, %v1395_v41  ;;  %v1418_v48 = vcombine.high %v1303_v30, %v1395_v41  ;;  %v1825_v43 = vpop.f32.mrf.mxu0 }
 0x504   : > { %v1409_v44 = vrot.slane %v1401_v39, %v2069_v52  ;;  %v1416_v45 = vrot.slane %v1402_v40, %v2069_v52  ;;  %v1831_v9 = vpop.f32.mrf.mxu1 }
 0x505   : > { %v1425_v46 = vrot.slane %v1417_v42, %v2069_v52  ;;  %v1432_v47 = vrot.slane %v1418_v48, %v2069_v52  ;;  %v1352_v51 = vpop.f32.mrf.mxu0 }
 0x506   : > { %v1398_v53 = vpop.f32.mrf.mxu1 }
 0x507   : > { %v1433_v54 = vcombine.low %v1409_v44, %v1425_v46  ;;  %v1434_v56 = vcombine.high %v1409_v44, %v1425_v46  ;;  %v1449_v57 = vcombine.low %v1416_v45, %v1432_v47  ;;  %v1450_v59 = vcombine.high %v1416_v45, %v1432_v47  ;;  %v1826_v60 = vpop.f32.mrf.mxu0 }
 0x508   : > { %v1832_v61 = vpop.f32.mrf.mxu1 }
 0x509   : > { %v1441_v0 = vrot.slane %v1433_v54, %v2082_v58  ;;  %v1448_v2 = vrot.slane %v1434_v56, %v2082_v58  ;;  %v1457_v3 = vrot.slane %v1449_v57, %v2082_v58  ;;  %v1464_v4 = vrot.slane %v1450_v59, %v2082_v58 }
 0x50b   : > { %v1469_v6 = vcombine.low %v1441_v0, %v1448_v2  ;;  %v1739_v7 = vcombine.high %v1441_v0, %v1448_v2  ;;  %v1485_v8 = vcombine.low %v1457_v3, %v1464_v4  ;;  %v1740_v10 = vcombine.high %v1457_v3, %v1464_v4 }
 0x50d   : > { %v1476_v11 = vrot.slane %v1469_v6, %v2069_v52  ;;  %v1484_v14 = vrot.slane %v1739_v7, %v2069_v52  ;;  %v1492_v34 = vrot.slane %v1485_v8, %v2069_v52  ;;  %v1500_v49 = vrot.slane %v1740_v10, %v2069_v52 }
 0x50f   : > { %v1502_v15 = vcombine.high %v1476_v11, %v1484_v14  ;;  %v1518_v16 = vcombine.high %v1492_v34, %v1500_v49  ;;  %v1501_v17 = vcombine.low %v1476_v11, %v1484_v14  ;;  %v1517_v18 = vcombine.low %v1492_v34, %v1500_v49 }
 0x511   : > { %v1516_v19 = vrot.slane %v1502_v15, %v2082_v58  ;;  %v1532_v12 = vrot.slane %v1518_v16, %v2082_v58  ;;  %v1509_v13 = vrot.slane %v1501_v17, %v2082_v58  ;;  %v1525_v22 = vrot.slane %v1517_v18, %v2082_v58 }
 0x513   : > { %v1535_v55 = vcombine.low %v1516_v19, %v1532_v12  ;;  %v1534_v50 = vcombine.high %v1509_v13, %v1525_v22  ;;  %v1533_v23 = vcombine.low %v1509_v13, %v1525_v22  ;;  %v1536_v52 = vcombine.high %v1516_v19, %v1532_v12 }
 0x515   : > { %1542 = vrot.lane.b32.xlu1 %v1535_v55, %s1928_s22  ;;  %1538 = vrot.lane.b32.xlu0 %v1534_v50, %s1929_s23 }
 0x519   : > { %1546 = vrot.lane.b32.xlu1 %v1536_v52, %s1930_s24 }
 0x587   : > { %v1543_v24 = vpop.permute.xlu1 %1542  ;;  %v1539_v25 = vpop.permute.xlu0 %1538 }
 0x588   : > { %v1549_v26 = vsel %vm967_vm2, %v1533_v23, %v1539_v25 }
 0x589   : > { %v1551_v28 = vsel %vm1550_vm4, %v1549_v26, %v1543_v24 }
 0x58b   : > { %v1547_v27 = vpop.permute.xlu1 %1546 }
 0x58c   : > { %v1553_v58 = vsel %vm1552_vm5, %v1551_v28, %v1547_v27 }
 0x58d   : > { %v1554_v29 = vpack.c.bf16 %v1553_v58, %v1553_v58 }
 0x58f   : > { %1838 = vmatmul.mubr.msk.bf16.vlgmr.msra.gmra.mxu0 %vm402_vm0, %v1554_v29 }
 0x64f   : > { %v1594_v20 = vpop.f32.mrf.mxu0 }
 0x650   : > { %v1600_v21 = vadd.f32 %v1594_v20, %v2007_v1 }
 0x651   : > { %v1839_v30 = vpop.f32.mrf.mxu0 }
 0x652   : > { %1601 = vst.msk [vmem:[%s379_s27] sm:$0xff] %vm402_vm0, %v1600_v21 }
 0x653   : > { %v1597_v31 = vpop.f32.mrf.mxu0 }
 0x655   : > { %v1840_v32 = vpop.f32.mrf.mxu0 }
 0x656 PF: > { %s18_s29 = sadd.s32 1, %s1918_s29   ;;  %s2269_s27 = smov %s1914_s28 }
 0x657   : > { %p15_p5 = scmp.ge.s32.totalorder %s18_s29, 4   ;;  %s2270_s28 = smov %s2272_s30 }
 0x659   :  { %17 = sbr.rel (!%p15_p5) target bundleno = 2 (0x2), region = 91 }

// kernel: _lambda_.16
= control target key start
LH: loop header
LB: loop body
LE: loop exit
PB: predicated region body
PF: predicated region fallthrough
CT: control target
= control target key end

     0   :  { %s1891_s24 = smov 0   ;;  %s1893_s25 = smov 0   ;;  %s2168_s0 = inlined_call_operand.vmem [shape: f32[2,8,32], index: 0, kind: input, shape index: {}]   ;;  %s2169_s1 = inlined_call_operand.vmem [shape: f32[2,8,32], index: 1, kind: input, shape index: {}]   ;;  %s2170_s2 = inlined_call_operand.vmem [shape: f32[1,32], index: 2, kind: input, shape index: {}]   ;;  %s2171_s3 = inlined_call_operand.vmem [shape: f32[32,32], index: 3, kind: input, shape index: {}]   ;;  %s2172_s4 = inlined_call_operand.vmem [shape: f32[32,64], index: 4, kind: input, shape index: {}]   ;;  %s2173_s5 = inlined_call_operand.vmem [shape: f32[32,32], index: 5, kind: input, shape index: {}]   ;;  %s2174_s6 = inlined_call_operand.vmem [shape: f32[2,1,8], index: 6, kind: input, shape index: {}]   ;;  %s2175_s7 = inlined_call_operand.vmem [shape: f32[2,8,32], index: 7, kind: output, shape index: {}]  }
   0x1   :  { %s1895_s26 = smov 0  }
   0x2 LB: > { %s29_s27 = sadd.s32 1, %s1834_s25  ;;  %p1640_p0 = scmp.ge.s32.totalorder %s1838_s26, 1  ;;  %s1838_s26 = sphi %s1895_s26, %s17_s26   ;;  %s1834_s25 = sphi %s1893_s25, %s2177_s25   ;;  %s1830_s24 = sphi %s1891_s24, %s2176_s24  }
   0x3   : > { %p31_p1 = scmp.ge.s32.totalorder %s29_s27, 2  ;;  %p272_p2 = scmp.lt.s32.totalorder %s1838_s26, 3 }
   0x5   : > { %s2179_s27 = smov (%p31_p1, %s29_s27), 0  ;;  %p273_p3 = pnand %p1640_p0, %p272_p2 }
   0x6   : > { %p315_p4 = scmp.lt.s32.totalorder (!%p273_p3), %s1830_s24, 1  ;;  %s1842_s11 = smov (!%p273_p3), 112  }
   0x7   : > { %276 = sbr.rel (%p273_p3) target bundleno = 1616 (0x650), region = 48  ;;  %s1843_s12 = smov (!%p273_p3), 120  }
   0x8   : > { %s1844_s14 = smov (!%p273_p3), 104   ;;  %s1848_s30 = smov (!%p273_p3), 16  }
   0x9   : > { %s1849_s8 = smov (!%p273_p3), 8   ;;  %s1850_s9 = smov (!%p273_p3), 24  }
   0xc   : > { %v346_v0 = vld [vmem:[%s2172_s4 + $0x10] sm:$0xff]  ;;  %v347_v1 = vld [vmem:[%s2172_s4 + $0x18] sm:$0xff]  ;;  %v344_v2 = vld [vmem:[%s2172_s4] sm:$0xff]  ;;  %v1840_v3 = vmov 0.0   ;;  %s2181_s24 = smov (!%p315_p4, %s1830_s24), 1  ;;  %vm1841_vm0 = vmmov 0   ;;  %v477_v32 = vlaneseq }
   0xd   : > { %1699 = vmatprep.subr.bf16.mxu1 %v1840_v3  ;;  %v418_v4 = vpack.c.bf16 %v347_v1, %v346_v0  ;;  %v345_v5 = vld [vmem:[%s2172_s4 + $0x8] sm:$0xff]  ;;  %1691 = vmatprep.subr.bf16.mxu0 %v1840_v3  ;;  %s1930_s13 = sshll.u32 %s2181_s24, 3  ;;  %vm354_vm1 = vcmask 261120   ;;  %v342_v12 = vld [vmem:[%s2171_s3 + $0x10] sm:$0xff]  ;;  %v343_v13 = vld [vmem:[%s2171_s3 + $0x18] sm:$0xff]  ;;  %vm918_vm2 = vcmask 64512   ;;  %s328_s17 = scalar_lea.vmem %s2174_s6, %s2181_s24 }
   0xe   : > { %1703 = vmatprep.mubr.msk.bf16.mxu1 %vm1841_vm0, %v1840_v3  ;;  %1695 = vmatprep.mubr.msk.bf16.mxu0 %vm1841_vm0, %v1840_v3  ;;  %v417_v6 = vpack.c.bf16 %v345_v5, %v344_v2  ;;  %s321_s16 = scalar_lea.vmem %s2168_s0, %s1930_s13  ;;  %s325_s19 = scalar_lea.vmem %s2169_s1, %s1930_s13  ;;  %v340_v14 = vld [vmem:[%s2171_s3] sm:$0xff]  ;;  %v372_v15 = vpack.c.bf16 %v343_v13, %v342_v12  ;;  %v341_v16 = vld [vmem:[%s2171_s3 + $0x8] sm:$0xff]  ;;  %v1845_v30 = vmov 1983009808   ;;  %v1979_v34 = vshrl.u32 %v477_v32, 7 }
   0xf   : > { %1700 = vmatpush3.bf16.msra.mxu1 %v418_v4  ;;  %v1941_v7 = vld [vmem:[%s321_s16] sm:$0xff]  ;;  %v371_v17 = vpack.c.bf16 %v341_v16, %v340_v14  ;;  %v475_v31 = vunpack.c.l.s4 %v1845_v30  ;;  %v1846_v35 = vmov 1934713408   ;;  %s1847_s24 = smov 96   ;;  %vm1158_vm3 = vcmask 1043456  }
  0x10   : > { %1701 = vmatprep.subr.bf16.mxu1 %v1840_v3  ;;  %v338_v8 = vld [vmem:[%s325_s19] sm:$0xff]  ;;  %v353_v9 = vmul.f32 %v1941_v7, %v1941_v7  ;;  %1692 = vmatpush3.bf16.msra.mxu0 %v372_v15  ;;  %v507_v36 = vunpack.c.l.s4 %v1846_v35  ;;  %vm1489_vm4 = vcmask 130048   ;;  %vm1491_vm5 = vcmask 195584  }
  0x11   : > { %v416_v10 = vpack.c.bf16 %v338_v8, %v338_v8  ;;  %1693 = vmatprep.subr.bf16.mxu0 %v1840_v3  ;;  %v1644_v22 = vld [vmem:[%s2170_s2] ss:$0 sm:$0xff]  ;;  %v476_v33 = vunpack.c.0.s8 %v475_v31 }
  0x12   : > { %v355_v11 = vsel %vm354_vm1, %v353_v9, 0.0  ;;  %v508_v42 = vunpack.c.0.s8 %v507_v36 }
  0x13   : > { %1702 = vmatpush3.bf16.msra.mxu1 %v417_v6  ;;  %356 = vadd.xlane.f32.xlu0 %v355_v11  ;;  %v1984_v38 = vsub.s32 %v476_v33, %v1979_v34 }
  0x14   : > { %1713 = vmatprep.subr.bf16.mxu1 %v1840_v3  ;;  %1694 = vmatpush3.bf16.msra.mxu0 %v371_v17  ;;  %v2001_v48 = vsub.s32 %v508_v42, %v1979_v34 }
  0x15   : > { %1707 = vmatprep.subr.bf16.mxu0 %v1840_v3 }
  0x16   : > { %1704 = vmatmul.mubr.msk.bf16.vlgmr.msra.gmra.mxu1 %vm354_vm1, %v416_v10 }
  0x17   : > { %1715 = vmatprep.mubr.msk.bf16.mxu1 %vm1841_vm0, %v1840_v3 }
  0x9c   : > { %v357_v18 = vpop.xlane.xlu0 %356 }
  0x9d   : > { %v359_v19 = vmul.f32 0.03125, %v357_v18 }
  0x9f   : > { %v360_v20 = vadd.f32 1e-06, %v359_v19 }
  0xa1   : > { %1798 = vrsqrt.f32 %v360_v20 }
  0xae   : > { %v1799_v21 = vpop.eup %1798 }
  0xaf   : > { %v362_v23 = vmul.f32 %v1799_v21, %v1941_v7 }
  0xb1   : > { %v369_v24 = vmul.f32 %v1644_v22, %v362_v23 }
  0xb3   : > { %v370_v25 = vpack.c.bf16 %v369_v24, %v369_v24 }
  0xb5   : > { %1696 = vmatmul.mubr.msk.bf16.vlgmr.msra.gmra.mxu0 %vm354_vm1, %v370_v25 }
  0xb6   : > { %1709 = vmatprep.mubr.msk.bf16.mxu0 %vm1841_vm0, %v1840_v3 }
  0xd6   : > { %v1971_v26 = vpop.f32.mrf.mxu1 }
  0xd7   : > { %612 = vrot.lane.b32.xlu1 %v1971_v26, %s1842_s11  ;;  %609 = vrot.lane.b32.xlu0 %v1971_v26, %s1843_s12 }
  0xd8   : > { %v1705_v27 = vpop.f32.mrf.mxu1 }
  0xda   : > { %v459_v28 = vpop.f32.mrf.mxu1 }
  0xdb   : > { %615 = vrot.lane.b32.xlu1 %v1971_v26, %s1844_s14 }
  0xdc   : > { %v1706_v29 = vpop.f32.mrf.mxu1 }
 0x149   : > { %v1981_v37 = vpop.permute.xlu1 %612  ;;  %v1990_v41 = vpop.permute.xlu0 %609 }
 0x14a   : > { %v618_v39 = vcombine.low %v1971_v26, %v1981_v37  ;;  %v619_v40 = vcombine.high %v1971_v26, %v1981_v37 }
 0x14c   : > { %v626_v44 = vrot.slane %v618_v39, %v1984_v38  ;;  %v633_v45 = vrot.slane %v619_v40, %v1984_v38 }
 0x14d   : > { %v1992_v43 = vpop.permute.xlu1 %615 }
 0x14e   : > { %v634_v46 = vcombine.low %v1990_v41, %v1992_v43  ;;  %v635_v47 = vcombine.high %v1990_v41, %v1992_v43 }
 0x150   : > { %v642_v49 = vrot.slane %v634_v46, %v1984_v38  ;;  %v649_v50 = vrot.slane %v635_v47, %v1984_v38 }
 0x152   : > { %v650_v51 = vcombine.low %v626_v44, %v642_v49  ;;  %v651_v52 = vcombine.high %v626_v44, %v642_v49  ;;  %v666_v53 = vcombine.low %v633_v45, %v649_v50  ;;  %v667_v54 = vcombine.high %v633_v45, %v649_v50 }
 0x154   : > { %v658_v55 = vrot.slane %v650_v51, %v2001_v48  ;;  %v665_v56 = vrot.slane %v651_v52, %v2001_v48  ;;  %v674_v57 = vrot.slane %v666_v53, %v2001_v48  ;;  %v681_v58 = vrot.slane %v667_v54, %v2001_v48 }
 0x156   : > { %v686_v59 = vcombine.low %v658_v55, %v665_v56  ;;  %v1649_v60 = vcombine.high %v658_v55, %v665_v56  ;;  %v702_v61 = vcombine.low %v674_v57, %v681_v58  ;;  %v1650_v62 = vcombine.high %v674_v57, %v681_v58 }
 0x158   : > { %v693_v63 = vrot.slane %v686_v59, %v1984_v38  ;;  %v701_v0 = vrot.slane %v1649_v60, %v1984_v38  ;;  %v709_v1 = vrot.slane %v702_v61, %v1984_v38  ;;  %v717_v2 = vrot.slane %v1650_v62, %v1984_v38 }
 0x15a   : > { %v718_v4 = vcombine.low %v693_v63, %v701_v0  ;;  %v734_v5 = vcombine.low %v709_v1, %v717_v2  ;;  %v719_v6 = vcombine.high %v693_v63, %v701_v0  ;;  %v735_v8 = vcombine.high %v709_v1, %v717_v2 }
 0x15c   : > { %v726_v9 = vrot.slane %v718_v4, %v2001_v48  ;;  %v742_v10 = vrot.slane %v734_v5, %v2001_v48  ;;  %v733_v11 = vrot.slane %v719_v6, %v2001_v48  ;;  %v749_v12 = vrot.slane %v735_v8, %v2001_v48 }
 0x15e   : > { %v750_v13 = vcombine.low %v726_v9, %v742_v10  ;;  %v751_v14 = vcombine.high %v726_v9, %v742_v10  ;;  %v752_v15 = vcombine.low %v733_v11, %v749_v12  ;;  %v753_v16 = vcombine.high %v733_v11, %v749_v12 }
 0x160   : > { %v906_v17 = vpack.c.bf16 %v750_v13, %v750_v13  ;;  %v907_v18 = vpack.c.bf16 %v751_v14, %v751_v14  ;;  %v908_v4 = vpack.c.bf16 %v752_v15, %v752_v15  ;;  %v909_v5 = vpack.c.bf16 %v753_v16, %v753_v16 }
 0x162   : > { %v923_v19 = vsel %vm918_vm2, %v906_v17, 0  ;;  %v969_v20 = vsel %vm918_vm2, %v907_v18, 0  ;;  %v1015_v11 = vsel %vm918_vm2, %v908_v4, 0  ;;  %v1061_v12 = vsel %vm918_vm2, %v909_v5, 0  ;;  %v352_v17 = vld [vmem:[%s328_s17] sm:$0x1] }
 0x163   : > { %1708 = vmatpush3.bf16.xpose.msra.mxu0 %v923_v19  ;;  %1714 = vmatpush3.bf16.xpose.msra.mxu1 %v969_v20  ;;  %v910_v18 = vsub.f32 1.0, %v352_v17  ;;  %v915_v20 = vsub.s32 0, %v1979_v34 }
 0x164   : > { %1719 = vmatprep.subr.bf16.mxu0 %v1840_v3  ;;  %1725 = vmatprep.subr.bf16.mxu1 %v1840_v3 }
 0x165   : > { %v911_v19 = vmul.f32 -1e+09, %v910_v18 }
 0x175   : > { %v410_v21 = vpop.f32.mrf.mxu0 }
 0x176   : > { %463 = vrot.lane.b32.xlu1 %v410_v21, %s1843_s12  ;;  %s335_s12 = scalar_lea.vmem %s2175_s7, %s1930_s13 }
 0x177   : > { %v1697_v22 = vpop.f32.mrf.mxu0 }
 0x179   : > { %v413_v23 = vpop.f32.mrf.mxu0 }
 0x17a   : > { %466 = vrot.lane.b32.xlu1 %v410_v21, %s1842_s11 }
 0x17b   : > { %v1698_v24 = vpop.f32.mrf.mxu0 }
 0x17e   : > { %469 = vrot.lane.b32.xlu1 %v410_v21, %s1844_s14 }
 0x1e8   : > { %v464_v25 = vpop.permute.xlu1 %463 }
 0x1ec   : > { %v467_v27 = vpop.permute.xlu1 %466 }
 0x1ed   : > { %v472_v28 = vcombine.low %v410_v21, %v467_v27  ;;  %v473_v29 = vcombine.high %v410_v21, %v467_v27  ;;  %v916_v21 = vrot.slane %v911_v19, %v915_v20 }
 0x1ef   : > { %v480_v33 = vrot.slane %v472_v28, %v1984_v38  ;;  %v487_v35 = vrot.slane %v473_v29, %v1984_v38 }
 0x1f0   : > { %v470_v30 = vpop.permute.xlu1 %469 }
 0x1f1   : > { %v488_v31 = vcombine.low %v464_v25, %v470_v30  ;;  %v489_v32 = vcombine.high %v464_v25, %v470_v30 }
 0x1f3   : > { %v496_v36 = vrot.slane %v488_v31, %v1984_v38  ;;  %v503_v39 = vrot.slane %v489_v32, %v1984_v38 }
 0x1f5   : > { %v504_v40 = vcombine.low %v480_v33, %v496_v36  ;;  %v505_v42 = vcombine.high %v480_v33, %v496_v36  ;;  %v520_v44 = vcombine.low %v487_v35, %v503_v39  ;;  %v521_v45 = vcombine.high %v487_v35, %v503_v39 }
 0x1f7   : > { %v512_v46 = vrot.slane %v504_v40, %v2001_v48  ;;  %v519_v47 = vrot.slane %v505_v42, %v2001_v48  ;;  %v528_v49 = vrot.slane %v520_v44, %v2001_v48  ;;  %v535_v50 = vrot.slane %v521_v45, %v2001_v48 }
 0x1f9   : > { %v540_v51 = vcombine.low %v512_v46, %v519_v47  ;;  %v1647_v52 = vcombine.high %v512_v46, %v519_v47  ;;  %v556_v53 = vcombine.low %v528_v49, %v535_v50  ;;  %v1648_v54 = vcombine.high %v528_v49, %v535_v50 }
 0x1fb   : > { %v547_v55 = vrot.slane %v540_v51, %v1984_v38  ;;  %v555_v56 = vrot.slane %v1647_v52, %v1984_v38  ;;  %v563_v57 = vrot.slane %v556_v53, %v1984_v38  ;;  %v571_v58 = vrot.slane %v1648_v54, %v1984_v38 }
 0x1fd   : > { %v572_v59 = vcombine.low %v547_v55, %v555_v56  ;;  %v588_v60 = vcombine.low %v563_v57, %v571_v58  ;;  %v573_v61 = vcombine.high %v547_v55, %v555_v56  ;;  %v589_v62 = vcombine.high %v563_v57, %v571_v58 }
 0x1ff   : > { %v580_v63 = vrot.slane %v572_v59, %v2001_v48  ;;  %v596_v0 = vrot.slane %v588_v60, %v2001_v48  ;;  %v587_v9 = vrot.slane %v573_v61, %v2001_v48  ;;  %v603_v10 = vrot.slane %v589_v62, %v2001_v48 }
 0x201   : > { %v604_v1 = vcombine.low %v580_v63, %v596_v0  ;;  %v605_v2 = vcombine.high %v580_v63, %v596_v0  ;;  %v606_v13 = vcombine.low %v587_v9, %v603_v10  ;;  %v607_v14 = vcombine.high %v587_v9, %v603_v10 }
 0x203   : > { %v902_v6 = vpack.c.bf16 %v604_v1, %v604_v1  ;;  %v903_v8 = vpack.c.bf16 %v605_v2, %v605_v2  ;;  %v904_v15 = vpack.c.bf16 %v606_v13, %v606_v13  ;;  %v905_v16 = vpack.c.bf16 %v607_v14, %v607_v14 }
 0x205   : > { %1710 = vmatmul.mubr.msk.bf16.vlgmr.msra.gmra.mxu0 %vm918_vm2, %v902_v6  ;;  %1716 = vmatmul.mubr.msk.bf16.vlgmr.msra.gmra.mxu1 %vm918_vm2, %v903_v8 }
 0x206   : > { %1720 = vmatpush3.bf16.xpose.msra.mxu0 %v1015_v11  ;;  %1726 = vmatpush3.bf16.xpose.msra.mxu1 %v1061_v12 }
 0x207   : > { %1721 = vmatprep.mubr.msk.bf16.mxu0 %vm1841_vm0, %v1840_v3  ;;  %1727 = vmatprep.mubr.msk.bf16.mxu1 %vm1841_vm0, %v1840_v3 }
 0x208   : > { %1731 = vmatprep.subr.bf16.mxu0 %v1840_v3  ;;  %1737 = vmatprep.subr.bf16.mxu1 %v1840_v3 }
 0x20d   : > { %1722 = vmatmul.mubr.msk.bf16.vlgmr.msra.gmra.mxu0 %vm918_vm2, %v904_v15  ;;  %1728 = vmatmul.mubr.msk.bf16.vlgmr.msra.gmra.mxu1 %vm918_vm2, %v905_v16 }
 0x20e   : > { %1733 = vmatprep.mubr.msk.bf16.mxu0 %vm1841_vm0, %v1840_v3  ;;  %1739 = vmatprep.mubr.msk.bf16.mxu1 %vm1841_vm0, %v1840_v3 }
 0x2c5   : > { %v959_v22 = vpop.f32.mrf.mxu0  ;;  %v1005_v23 = vpop.f32.mrf.mxu1 }
 0x2c6   : > { %v960_v24 = vadd.f32 %v959_v22, %v916_v21  ;;  %v1006_v25 = vadd.f32 %v1005_v23, %v916_v21 }
 0x2c7   : > { %v1711_v27 = vpop.f32.mrf.mxu0  ;;  %v1717_v28 = vpop.f32.mrf.mxu1 }
 0x2c8   : > { %v1106_v29 = vsel %vm918_vm2, %v1006_v25, -inf  ;;  %v1103_v30 = vsel %vm918_vm2, %v960_v24, -inf }
 0x2c9   : > { %1107 = vmax.xlane.f32.xlu0 %v1106_v29  ;;  %v1008_v31 = vpop.f32.mrf.mxu1  ;;  %1104 = vmax.xlane.f32.xlu1 %v1103_v30  ;;  %v962_v32 = vpop.f32.mrf.mxu0 }
 0x2cb   : > { %v1712_v33 = vpop.f32.mrf.mxu0  ;;  %v1718_v35 = vpop.f32.mrf.mxu1 }
 0x2cd   : > { %v1051_v36 = vpop.f32.mrf.mxu0  ;;  %v1097_v39 = vpop.f32.mrf.mxu1 }
 0x2ce   : > { %v1052_v34 = vadd.f32 %v1051_v36, %v916_v21  ;;  %v1098_v40 = vadd.f32 %v1097_v39, %v916_v21 }
 0x2cf   : > { %v1723_v42 = vpop.f32.mrf.mxu0  ;;  %v1729_v44 = vpop.f32.mrf.mxu1 }
 0x2d0   : > { %v1112_v45 = vsel %vm918_vm2, %v1098_v40, -inf  ;;  %v1109_v46 = vsel %vm918_vm2, %v1052_v34, -inf }
 0x2d1   : > { %1113 = vmax.xlane.f32.xlu0 %v1112_v45  ;;  %v1100_v47 = vpop.f32.mrf.mxu1  ;;  %1110 = vmax.xlane.f32.xlu1 %v1109_v46  ;;  %v1054_v49 = vpop.f32.mrf.mxu0 }
 0x2d3   : > { %v1724_v50 = vpop.f32.mrf.mxu0  ;;  %v1730_v51 = vpop.f32.mrf.mxu1 }
 0x2e2   : > { %754 = vrot.lane.b32.xlu1 %v1971_v26, %s1847_s24 }
 0x352   : > { %v1108_v52 = vpop.xlane.xlu0 %1107  ;;  %v1105_v53 = vpop.xlane.xlu1 %1104 }
 0x353   : > { %v1116_v54 = vsub.f32 %v1006_v25, %v1108_v52  ;;  %v1115_v55 = vsub.f32 %v960_v24, %v1105_v53 }
 0x355   : > { %v1121_v56 = vmul.f32 1.442695, %v1116_v54  ;;  %v1119_v57 = vmul.f32 1.442695, %v1115_v55 }
 0x357   : > { %1800 = vpow2.f32 %v1121_v56 }
 0x358   : > { %1802 = vpow2.f32 %v1119_v57 }
 0x35a   : > { %v1111_v26 = vpop.xlane.xlu1 %1110  ;;  %v1114_v63 = vpop.xlane.xlu0 %1113 }
 0x35b   : > { %v1117_v62 = vsub.f32 %v1052_v34, %v1111_v26  ;;  %v1118_v1 = vsub.f32 %v1098_v40, %v1114_v63 }
 0x35d   : > { %v1123_v0 = vmul.f32 1.442695, %v1117_v62  ;;  %v1125_v2 = vmul.f32 1.442695, %v1118_v1 }
 0x35f   : > { %1804 = vpow2.f32 %v1123_v0 }
 0x360   : > { %1806 = vpow2.f32 %v1125_v2 }
 0x364   : > { %v2066_v58 = vpop.eup %1800 }
 0x365   : > { %v2068_v59 = vpop.eup %1802  ;;  %v1130_v60 = vsel %vm918_vm2, %v2066_v58, 0.0 }
 0x366   : > { %1131 = vadd.xlane.f32.xlu0 %v1130_v60  ;;  %v1127_v61 = vsel %vm918_vm2, %v2068_v59, 0.0 }
 0x367   : > { %1128 = vadd.xlane.f32.xlu1 %v1127_v61 }
 0x36c   : > { %v2077_v4 = vpop.eup %1804 }
 0x36d   : > { %v1133_v5 = vsel %vm918_vm2, %v2077_v4, 0.0  ;;  %v2081_v6 = vpop.eup %1806 }
 0x378   : > { %758 = vrot.lane.b32.xlu1 %v1981_v37, %s1847_s24  ;;  %v1136_v37 = vsel %vm918_vm2, %v2081_v6, 0.0 }
 0x37c   : > { %760 = vrot.lane.b32.xlu1 %v1992_v43, %s1847_s24  ;;  %756 = vrot.lane.b32.xlu0 %v1990_v41, %s1847_s24  ;;  %v755_v41 = vpop.permute.xlu1 %754 }
 0x39b   : > { %1134 = vadd.xlane.f32.xlu0 %v1133_v5 }
 0x3a0   : > { %1137 = vadd.xlane.f32.xlu1 %v1136_v37 }
 0x3ef   : > { %v1132_v8 = vpop.xlane.xlu0 %1131 }
 0x3f0   : > { %v1129_v43 = vpop.xlane.xlu1 %1128  ;;  %1808 = vrcp.f32 %v1132_v8 }
 0x3f1   : > { %1810 = vrcp.f32 %v1129_v43 }
 0x3f3   : > { %v757_v12 = vpop.permute.xlu0 %756 }
 0x3f4   : > { %v759_v9 = vpop.permute.xlu1 %758 }
 0x3f5   : > { %v766_v10 = vcombine.low %v755_v41, %v759_v9  ;;  %v767_v11 = vcombine.high %v755_v41, %v759_v9 }
 0x3f7   : > { %v774_v16 = vrot.slane %v766_v10, %v1984_v38  ;;  %v781_v17 = vrot.slane %v767_v11, %v1984_v38 }
 0x3f8   : > { %v761_v13 = vpop.permute.xlu1 %760 }
 0x3f9   : > { %v782_v14 = vcombine.low %v757_v12, %v761_v13  ;;  %v783_v15 = vcombine.high %v757_v12, %v761_v13  ;;  %v350_v12 = vld [vmem:[%s2173_s5 + $0x10] sm:$0xff] }
 0x3fb   : > { %v790_v18 = vrot.slane %v782_v14, %v1984_v38  ;;  %v797_v19 = vrot.slane %v783_v15, %v1984_v38 }
 0x3fd   : > { %v798_v20 = vcombine.low %v774_v16, %v790_v18  ;;  %v799_v21 = vcombine.high %v774_v16, %v790_v18  ;;  %v814_v22 = vcombine.low %v781_v17, %v797_v19  ;;  %v815_v23 = vcombine.high %v781_v17, %v797_v19  ;;  %v1809_v45 = vpop.eup %1808 }
 0x3fe   : > { %v1811_v46 = vpop.eup %1810  ;;  %v1142_v61 = vmul.f32 %v1809_v45, %v2066_v58  ;;  %v348_v45 = vld [vmem:[%s2173_s5] sm:$0xff] }
 0x3ff   : > { %v806_v24 = vrot.slane %v798_v20, %v2001_v48  ;;  %v813_v25 = vrot.slane %v799_v21, %v2001_v48  ;;  %v822_v27 = vrot.slane %v814_v22, %v2001_v48  ;;  %v829_v28 = vrot.slane %v815_v23, %v2001_v48 }
 0x400   : > { %v1140_v60 = vmul.f32 %v1811_v46, %v2068_v59  ;;  %v1148_v2 = vpack.c.bf16 %v1142_v61, %v1142_v61  ;;  %v349_v46 = vld [vmem:[%s2173_s5 + $0x8] sm:$0xff] }
 0x401   : > { %v834_v29 = vcombine.low %v806_v24, %v813_v25  ;;  %v1651_v30 = vcombine.high %v806_v24, %v813_v25  ;;  %v850_v31 = vcombine.low %v822_v27, %v829_v28  ;;  %v1652_v32 = vcombine.high %v822_v27, %v829_v28 }
 0x402   : > { %v1147_v1 = vpack.c.bf16 %v1140_v60, %v1140_v60 }
 0x403   : > { %v841_v33 = vrot.slane %v834_v29, %v1984_v38  ;;  %v849_v35 = vrot.slane %v1651_v30, %v1984_v38  ;;  %v857_v36 = vrot.slane %v850_v31, %v1984_v38  ;;  %v865_v39 = vrot.slane %v1652_v32, %v1984_v38 }
 0x405   : > { %v866_v34 = vcombine.low %v841_v33, %v849_v35  ;;  %v882_v40 = vcombine.low %v857_v36, %v865_v39  ;;  %v867_v42 = vcombine.high %v841_v33, %v849_v35  ;;  %v883_v44 = vcombine.high %v857_v36, %v865_v39 }
 0x407   : > { %v874_v47 = vrot.slane %v866_v34, %v2001_v48  ;;  %v890_v49 = vrot.slane %v882_v40, %v2001_v48  ;;  %v881_v50 = vrot.slane %v867_v42, %v2001_v48  ;;  %v897_v51 = vrot.slane %v883_v44, %v2001_v48 }
 0x409   : > { %v898_v52 = vcombine.low %v874_v47, %v890_v49  ;;  %v899_v53 = vcombine.high %v874_v47, %v890_v49  ;;  %v900_v54 = vcombine.low %v881_v50, %v897_v51  ;;  %v901_v55 = vcombine.high %v881_v50, %v897_v51 }
 0x40b   : > { %v1151_v56 = vpack.c.bf16 %v898_v52, %v898_v52  ;;  %v1152_v57 = vpack.c.bf16 %v899_v53, %v899_v53  ;;  %v1153_v63 = vpack.c.bf16 %v900_v54, %v900_v54  ;;  %v1154_v0 = vpack.c.bf16 %v901_v55, %v901_v55 }
 0x40c   : > { %v1494_v52 = vpack.c.bf16 %v349_v46, %v348_v45 }
 0x40d   : > { %v1160_v26 = vsel %vm1158_vm3, %v1151_v56, 0  ;;  %v1206_v62 = vsel %vm1158_vm3, %v1152_v57, 0  ;;  %v1252_v58 = vsel %vm1158_vm3, %v1153_v63, 0  ;;  %v1298_v59 = vsel %vm1158_vm3, %v1154_v0, 0 }
 0x40e   : > { %1732 = vmatpush3.bf16.msra.mxu0 %v1160_v26  ;;  %1738 = vmatpush3.bf16.msra.mxu1 %v1206_v62 }
 0x40f   : > { %1743 = vmatprep.subr.bf16.mxu0 %v1840_v3  ;;  %1749 = vmatprep.subr.bf16.mxu1 %v1840_v3 }
 0x411   : > { %1734 = vmatmul.mubr.msk.bf16.vlgmr.msra.gmra.mxu0 %vm918_vm2, %v1147_v1  ;;  %1740 = vmatmul.mubr.msk.bf16.vlgmr.msra.gmra.mxu1 %vm918_vm2, %v1148_v2 }
 0x412   : > { %1744 = vmatpush3.bf16.msra.mxu0 %v1252_v58  ;;  %1750 = vmatpush3.bf16.msra.mxu1 %v1298_v59 }
 0x413   : > { %1745 = vmatprep.mubr.msk.bf16.mxu0 %vm1841_vm0, %v1840_v3  ;;  %1751 = vmatprep.mubr.msk.bf16.mxu1 %vm1841_vm0, %v1840_v3 }
 0x414   : > { %1755 = vmatprep.subr.bf16.mxu0 %v1840_v3 }
 0x424   : > { %v1135_v5 = vpop.xlane.xlu0 %1134 }
 0x425   : > { %1812 = vrcp.f32 %v1135_v5 }
 0x429   : > { %v1138_v37 = vpop.xlane.xlu1 %1137 }
 0x42a   : > { %1814 = vrcp.f32 %v1138_v37 }
 0x432   : > { %v1813_v41 = vpop.eup %1812 }
 0x433   : > { %v1144_v43 = vmul.f32 %v1813_v41, %v2077_v4  ;;  %v351_v4 = vld [vmem:[%s2173_s5 + $0x18] sm:$0xff] }
 0x434   : > { %v1495_v13 = vpack.c.bf16 %v351_v4, %v350_v12 }
 0x435   : > { %v1149_v8 = vpack.c.bf16 %v1144_v43, %v1144_v43 }
 0x437   : > { %v1815_v9 = vpop.eup %1814  ;;  %1746 = vmatmul.mubr.msk.bf16.vlgmr.msra.gmra.mxu0 %vm918_vm2, %v1149_v8 }
 0x438   : > { %v1146_v10 = vmul.f32 %v1815_v9, %v2081_v6  ;;  %1759 = vmatprep.mubr.msk.bf16.mxu0 %vm1841_vm0, %v1840_v3  ;;  %1756 = vmatpush3.bf16.msra.mxu0 %v1495_v13 }
 0x439   : > { %1757 = vmatprep.subr.bf16.mxu0 %v1840_v3 }
 0x43a   : > { %v1150_v11 = vpack.c.bf16 %v1146_v10, %v1146_v10 }
 0x43c   : > { %1752 = vmatmul.mubr.msk.bf16.vlgmr.msra.gmra.mxu1 %vm918_vm2, %v1150_v11  ;;  %1758 = vmatpush3.bf16.msra.mxu0 %v1494_v52 }
 0x4d1   : > { %v1196_v14 = vpop.f32.mrf.mxu0  ;;  %v1242_v6 = vpop.f32.mrf.mxu1 }
 0x4d3   : > { %v1735_v15 = vpop.f32.mrf.mxu0  ;;  %v1741_v16 = vpop.f32.mrf.mxu1 }
 0x4d5   : > { %v1199_v17 = vpop.f32.mrf.mxu0  ;;  %v1245_v18 = vpop.f32.mrf.mxu1 }
 0x4d7   : > { %v1736_v19 = vpop.f32.mrf.mxu0  ;;  %v1742_v20 = vpop.f32.mrf.mxu1 }
 0x4f7   : > { %v1288_v21 = vpop.f32.mrf.mxu0 }
 0x4f8   : > { %v1340_v23 = vcombine.low %v1196_v14, %v1288_v21  ;;  %v1341_v24 = vcombine.high %v1196_v14, %v1288_v21 }
 0x4f9   : > { %v1747_v22 = vpop.f32.mrf.mxu0 }
 0x4fa   : > { %v1348_v3 = vrot.slane %v1340_v23, %v1984_v38  ;;  %v1355_v32 = vrot.slane %v1341_v24, %v1984_v38 }
 0x4fb   : > { %v1291_v25 = vpop.f32.mrf.mxu0 }
 0x4fc   : > { %v1334_v27 = vpop.f32.mrf.mxu1 }
 0x4fd   : > { %v1356_v28 = vcombine.low %v1242_v6, %v1334_v27  ;;  %v1357_v29 = vcombine.high %v1242_v6, %v1334_v27  ;;  %v1748_v30 = vpop.f32.mrf.mxu0 }
 0x4fe   : > { %v1753_v31 = vpop.f32.mrf.mxu1 }
 0x4ff   : > { %v1364_v33 = vrot.slane %v1356_v28, %v1984_v38  ;;  %v1371_v35 = vrot.slane %v1357_v29, %v1984_v38 }
 0x500   : > { %v1337_v36 = vpop.f32.mrf.mxu1 }
 0x501   : > { %v1372_v39 = vcombine.low %v1348_v3, %v1364_v33  ;;  %v1373_v34 = vcombine.high %v1348_v3, %v1364_v33  ;;  %v1388_v40 = vcombine.low %v1355_v32, %v1371_v35  ;;  %v1389_v42 = vcombine.high %v1355_v32, %v1371_v35 }
 0x502   : > { %v1754_v44 = vpop.f32.mrf.mxu1 }
 0x503   : > { %v1380_v47 = vrot.slane %v1372_v39, %v2001_v48  ;;  %v1387_v49 = vrot.slane %v1373_v34, %v2001_v48  ;;  %v1396_v50 = vrot.slane %v1388_v40, %v2001_v48  ;;  %v1403_v51 = vrot.slane %v1389_v42, %v2001_v48 }
 0x505   : > { %v1408_v53 = vcombine.low %v1380_v47, %v1387_v49  ;;  %v1661_v54 = vcombine.high %v1380_v47, %v1387_v49  ;;  %v1424_v55 = vcombine.low %v1396_v50, %v1403_v51  ;;  %v1662_v56 = vcombine.high %v1396_v50, %v1403_v51 }
 0x507   : > { %v1415_v57 = vrot.slane %v1408_v53, %v1984_v38  ;;  %v1423_v60 = vrot.slane %v1661_v54, %v1984_v38  ;;  %v1431_v61 = vrot.slane %v1424_v55, %v1984_v38  ;;  %v1439_v26 = vrot.slane %v1662_v56, %v1984_v38 }
 0x509   : > { %v1441_v62 = vcombine.high %v1415_v57, %v1423_v60  ;;  %v1457_v63 = vcombine.high %v1431_v61, %v1439_v26  ;;  %v1440_v0 = vcombine.low %v1415_v57, %v1423_v60  ;;  %v1456_v1 = vcombine.low %v1431_v61, %v1439_v26 }
 0x50b   : > { %v1455_v2 = vrot.slane %v1441_v62, %v2001_v48  ;;  %v1471_v58 = vrot.slane %v1457_v63, %v2001_v48  ;;  %v1448_v59 = vrot.slane %v1440_v0, %v2001_v48  ;;  %v1464_v5 = vrot.slane %v1456_v1, %v2001_v48 }
 0x50d   : > { %v1474_v37 = vcombine.low %v1455_v2, %v1471_v58  ;;  %v1473_v41 = vcombine.high %v1448_v59, %v1464_v5  ;;  %v1472_v43 = vcombine.low %v1448_v59, %v1464_v5  ;;  %v1475_v38 = vcombine.high %v1455_v2, %v1471_v58 }
 0x50f   : > { %1481 = vrot.lane.b32.xlu1 %v1474_v37, %s1848_s30  ;;  %1477 = vrot.lane.b32.xlu0 %v1473_v41, %s1849_s8 }
 0x513   : > { %1485 = vrot.lane.b32.xlu0 %v1475_v38, %s1850_s9 }
 0x581   : > { %v1478_v8 = vpop.permute.xlu0 %1477  ;;  %v1482_v9 = vpop.permute.xlu1 %1481 }
 0x582   : > { %v1488_v10 = vsel %vm918_vm2, %v1472_v43, %v1478_v8 }
 0x583   : > { %v1490_v12 = vsel %vm1489_vm4, %v1488_v10, %v1482_v9 }
 0x585   : > { %v1486_v11 = vpop.permute.xlu0 %1485 }
 0x586   : > { %v1492_v48 = vsel %vm1491_vm5, %v1490_v12, %v1486_v11 }
 0x587   : > { %v1493_v4 = vpack.c.bf16 %v1492_v48, %v1492_v48 }
 0x589   : > { %1760 = vmatmul.mubr.msk.bf16.vlgmr.msra.gmra.mxu0 %vm354_vm1, %v1493_v4 }
 0x649   : > { %v1533_v13 = vpop.f32.mrf.mxu0 }
 0x64a   : > { %v1539_v14 = vadd.f32 %v1533_v13, %v1941_v7 }
 0x64b   : > { %v1761_v6 = vpop.f32.mrf.mxu0 }
 0x64c   : > { %1540 = vst.msk [vmem:[%s335_s12] sm:$0xff] %vm354_vm1, %v1539_v14 }
 0x64d   : > { %v1536_v15 = vpop.f32.mrf.mxu0 }
 0x64f   : > { %v1762_v16 = vpop.f32.mrf.mxu0 }
 0x650 PF: > { %s17_s26 = sadd.s32 1, %s1838_s26   ;;  %s2176_s24 = smov %s1834_s25 }
 0x651   : > { %p14_p5 = scmp.ge.s32.totalorder %s17_s26, 4   ;;  %s2177_s25 = smov %s2179_s27 }
 0x653   :  { %16 = sbr.rel (!%p14_p5) target bundleno = 2 (0x2), region = 84 }

// kernel: _lambda_.21
= control target key start
LH: loop header
LB: loop body
LE: loop exit
PB: predicated region body
PF: predicated region fallthrough
CT: control target
= control target key end

     0   :  { %vm31_vm0 = vcmask 261120   ;;  %v273_v2 = vmov 0.0   ;;  %vm274_vm1 = vmmov 0   ;;  %vm21_vm2 = vcmask 7168   ;;  %s413_s0 = inlined_call_operand.vmem [shape: f32[16,32], index: 0, kind: input, shape index: {}]   ;;  %s414_s2 = inlined_call_operand.vmem [shape: f32[128,32], index: 2, kind: input, shape index: {}]   ;;  %s415_s1 = inlined_call_operand.vmem [shape: f32[1,32], index: 1, kind: input, shape index: {}]   ;;  %s416_s3 = inlined_call_operand.vmem [shape: f32[16,128], index: 3, kind: output, shape index: {0}]   ;;  %s417_s4 = inlined_call_operand.vmem [shape: f32[16,1], index: 4, kind: output, shape index: {1}]  }
   0x1   :  { %v305_v0 = vld [vmem:[%s413_s0] sm:$0xff]  ;;  %v310_v1 = vld [vmem:[%s413_s0 + $0x8] sm:$0xff]  ;;  %231 = vmatprep.subr.bf16.mxu0 %v273_v2  ;;  %v72_v3 = vld [vmem:[%s414_s2 + $0x70] sm:$0xff]  ;;  %247 = vmatprep.mubr.msk.bf16.mxu0 %vm274_vm1, %v273_v2  ;;  %v275_v55 = vmov -inf   ;;  %24 = vst.msk [vmem:[#allocation3] sm:$0xff] %vm21_vm2, %v273_v2  ;;  %v276_v60 = vmov 0  }
   0x2   :  { %v29_v4 = vmul.f32 %v305_v0, %v305_v0  ;;  %v30_v5 = vmul.f32 %v310_v1, %v310_v1  ;;  %v73_v6 = vld [vmem:[%s414_s2 + $0x78] sm:$0xff]  ;;  %v70_v9 = vld [vmem:[%s414_s2 + $0x60] sm:$0xff]  ;;  %v71_v10 = vld [vmem:[%s414_s2 + $0x68] sm:$0xff]  ;;  %22 = vst.msk [vmem:[#allocation2] sm:$0xff] %vm21_vm2, %v275_v55  ;;  %255 = vset.pattern.permute.xlu0 %v276_v60  ;;  %256 = vset.pattern.permute.xlu1 %v276_v60 }
   0x3   :  { %v81_v7 = vpack.c.bf16 %v73_v6, %v72_v3  ;;  %v80_v13 = vpack.c.bf16 %v71_v10, %v70_v9  ;;  %v68_v15 = vld [vmem:[%s414_s2 + $0x50] sm:$0xff]  ;;  %v69_v16 = vld [vmem:[%s414_s2 + $0x58] sm:$0xff]  ;;  %v66_v19 = vld [vmem:[%s414_s2 + $0x40] sm:$0xff]  ;;  %23 = vst.msk [vmem:[#allocation2 + $0x8] sm:$0xff] %vm21_vm2, %v275_v55 }
   0x4   :  { %v32_v8 = vsel %vm31_vm0, %v29_v4, 0.0  ;;  %v35_v12 = vsel %vm31_vm0, %v30_v5, 0.0  ;;  %v79_v17 = vpack.c.bf16 %v69_v16, %v68_v15  ;;  %v67_v20 = vld [vmem:[%s414_s2 + $0x48] sm:$0xff]  ;;  %v64_v23 = vld [vmem:[%s414_s2 + $0x30] sm:$0xff]  ;;  %v65_v24 = vld [vmem:[%s414_s2 + $0x38] sm:$0xff]  ;;  %25 = vst.msk [vmem:[#allocation3 + $0x8] sm:$0xff] %vm21_vm2, %v273_v2 }
   0x5   :  { %33 = vadd.xlane.f32.xlu0 %v32_v8  ;;  %v107_v11 = vsel %vm31_vm0, %v81_v7, 0  ;;  %v104_v14 = vsel %vm31_vm0, %v80_v13, 0  ;;  %v78_v21 = vpack.c.bf16 %v67_v20, %v66_v19  ;;  %v77_v25 = vpack.c.bf16 %v65_v24, %v64_v23  ;;  %v62_v27 = vld [vmem:[%s414_s2 + $0x20] sm:$0xff]  ;;  %v63_v28 = vld [vmem:[%s414_s2 + $0x28] sm:$0xff]  ;;  %v60_v31 = vld [vmem:[%s414_s2 + $0x10] sm:$0xff] }
   0x6   :  { %232 = vmatpush3.bf16.xpose.msra.mxu0 %v107_v11  ;;  %v101_v18 = vsel %vm31_vm0, %v79_v17, 0  ;;  %v76_v29 = vpack.c.bf16 %v63_v28, %v62_v27  ;;  %v61_v32 = vld [vmem:[%s414_s2 + $0x18] sm:$0xff]  ;;  %v58_v35 = vld [vmem:[%s414_s2] sm:$0xff]  ;;  %v59_v36 = vld [vmem:[%s414_s2 + $0x8] sm:$0xff] }
   0x7   :  { %233 = vmatprep.subr.bf16.mxu0 %v273_v2  ;;  %v98_v22 = vsel %vm31_vm0, %v78_v21, 0  ;;  %v95_v26 = vsel %vm31_vm0, %v77_v25, 0  ;;  %v75_v33 = vpack.c.bf16 %v61_v32, %v60_v31  ;;  %v74_v37 = vpack.c.bf16 %v59_v36, %v58_v35  ;;  %v220_v47 = vld [vmem:[%s415_s1] ss:$0 sm:$0xff] }
   0x8   :  { %v92_v30 = vsel %vm31_vm0, %v76_v29, 0  ;;  %v160_v16 = vld [vmem:[#allocation3] sm:$0xff] }
   0x9   :  { %36 = vadd.xlane.f32.xlu0 %v35_v12  ;;  %v89_v34 = vsel %vm31_vm0, %v75_v33, 0  ;;  %v86_v38 = vsel %vm31_vm0, %v74_v37, 0  ;;  %v152_v61 = vld [vmem:[#allocation2] sm:$0xff] }
   0xb   :  { %v161_v20 = vld [vmem:[#allocation3 + $0x8] sm:$0xff] }
   0xe   :  { %234 = vmatpush3.bf16.xpose.msra.mxu0 %v104_v14 }
   0xf   :  { %235 = vmatprep.subr.bf16.mxu0 %v273_v2 }
  0x16   :  { %236 = vmatpush3.bf16.xpose.msra.mxu0 %v101_v18 }
  0x17   :  { %237 = vmatprep.subr.bf16.mxu0 %v273_v2 }
  0x1e   :  { %238 = vmatpush3.bf16.xpose.msra.mxu0 %v98_v22 }
  0x1f   :  { %239 = vmatprep.subr.bf16.mxu0 %v273_v2 }
  0x26   :  { %240 = vmatpush3.bf16.xpose.msra.mxu0 %v95_v26 }
  0x27   :  { %241 = vmatprep.subr.bf16.mxu0 %v273_v2 }
  0x2e   :  { %242 = vmatpush3.bf16.xpose.msra.mxu0 %v92_v30 }
  0x2f   :  { %243 = vmatprep.subr.bf16.mxu0 %v273_v2 }
  0x36   :  { %244 = vmatpush3.bf16.xpose.msra.mxu0 %v89_v34 }
  0x37   :  { %245 = vmatprep.subr.bf16.mxu0 %v273_v2 }
  0x3e   :  { %246 = vmatpush3.bf16.xpose.msra.mxu0 %v86_v38 }
  0x8e   :  { %v34_v39 = vpop.xlane.xlu0 %33 }
  0x8f   :  { %v39_v40 = vmul.f32 0.03125, %v34_v39 }
  0x91   :  { %v41_v41 = vadd.f32 1e-06, %v39_v40 }
  0x92   :  { %v37_v42 = vpop.xlane.xlu0 %36 }
  0x93   :  { %257 = vrsqrt.f32 %v41_v41  ;;  %v40_v43 = vmul.f32 0.03125, %v37_v42 }
  0x95   :  { %v42_v44 = vadd.f32 1e-06, %v40_v43 }
  0x97   :  { %259 = vrsqrt.f32 %v42_v44 }
  0xa0   :  { %v258_v45 = vpop.eup %257 }
  0xa1   :  { %v45_v46 = vmul.f32 %v258_v45, %v305_v0  ;;  %v153_v0 = vld [vmem:[#allocation2 + $0x8] sm:$0xff] }
  0xa3   :  { %v53_v50 = vmul.f32 %v220_v47, %v45_v46 }
  0xa4   :  { %v260_v48 = vpop.eup %259 }
  0xa5   :  { %v46_v49 = vmul.f32 %v260_v48, %v310_v1  ;;  %v55_v52 = vmul.f32 0.17677669, %v53_v50 }
  0xa7   :  { %v54_v51 = vmul.f32 %v220_v47, %v46_v49 }
  0xa9   :  { %v56_v53 = vmul.f32 0.17677669, %v54_v51 }
  0xab   :  { %v57_v54 = vpack.c.bf16 %v56_v53, %v55_v52 }
  0xad   :  { %248 = vmatmul.mubr.msk.bf16.vlgmr.msra.gmra.mxu0 %vm31_vm0, %v57_v54 }
 0x16d   :  { %v143_v56 = vpop.f32.mrf.mxu0 }
 0x16e   :  { %150 = vst [vmem:[%s416_s3] sm:$0xff] %v143_v56  ;;  %154 = vmax.xlane.f32.xlu1 %v143_v56 }
 0x16f   :  { %v249_v57 = vpop.f32.mrf.mxu0 }
 0x171   :  { %v146_v58 = vpop.f32.mrf.mxu0 }
 0x172   :  { %151 = vst [vmem:[%s416_s3 + $0x8] sm:$0xff] %v146_v58  ;;  %156 = vmax.xlane.f32.xlu1 %v146_v58 }
 0x173   :  { %v250_v59 = vpop.f32.mrf.mxu0 }
 0x1f7   :  { %v155_v62 = vpop.xlane.xlu1 %154 }
 0x1f8   :  { %v158_v63 = vmax.f32 %v152_v61, %v155_v62 }
 0x1fa   :  { %v162_v1 = vsub.f32 %v152_v61, %v158_v63  ;;  %195 = vst.msk [vmem:[#allocation2] sm:$0xff] %vm21_vm2, %v158_v63  ;;  %172 = vperm.xlu0 %255, %v158_v63  }
 0x1fb   :  { %v157_v2 = vpop.xlane.xlu1 %156 }
 0x1fc   :  { %v159_v3 = vmax.f32 %v153_v0, %v157_v2  ;;  %v164_v13 = vmul.f32 1.442695, %v162_v1 }
 0x1fe   :  { %v163_v4 = vsub.f32 %v153_v0, %v159_v3  ;;  %196 = vst.msk [vmem:[#allocation2 + $0x8] sm:$0xff] %vm21_vm2, %v159_v3  ;;  %177 = vperm.xlu1 %256, %v159_v3  }
 0x200   :  { %v166_v14 = vmul.f32 1.442695, %v163_v4 }
 0x201   :  { %v200_v29 = vld [vmem:[#allocation2] sm:$0xff] }
 0x205   :  { %v201_v33 = vld [vmem:[#allocation2 + $0x8] sm:$0xff] }
 0x275   :  { %v173_v5 = vpop.permute.xlu0 %172 }
 0x276   :  { %v180_v6 = vsub.f32 %v143_v56, %v173_v5 }
 0x278   :  { %v182_v7 = vmul.f32 1.442695, %v180_v6 }
 0x279   :  { %v178_v8 = vpop.permute.xlu1 %177 }
 0x27a   :  { %261 = vpow2.f32 %v182_v7  ;;  %v181_v9 = vsub.f32 %v146_v58, %v178_v8 }
 0x27c   :  { %v184_v10 = vmul.f32 1.442695, %v181_v9 }
 0x27e   :  { %263 = vpow2.f32 %v184_v10 }
 0x27f   :  { %265 = vpow2.f32 %v164_v13 }
 0x280   :  { %267 = vpow2.f32 %v166_v14 }
 0x287   :  { %v262_v11 = vpop.eup %261 }
 0x288   :  { %186 = vadd.xlane.f32.xlu1 %v262_v11 }
 0x28b   :  { %v264_v12 = vpop.eup %263 }
 0x28c   :  { %188 = vadd.xlane.f32.xlu0 %v264_v12  ;;  %v266_v15 = vpop.eup %265 }
 0x28d   :  { %v168_v17 = vmul.f32 %v266_v15, %v160_v16  ;;  %v268_v18 = vpop.eup %267 }
 0x28e   :  { %v169_v22 = vmul.f32 %v268_v18, %v161_v20 }
 0x311   :  { %v187_v19 = vpop.xlane.xlu1 %186 }
 0x312   :  { %v190_v21 = vadd.f32 %v187_v19, %v168_v17 }
 0x314   :  { %193 = vst.msk [vmem:[#allocation3] sm:$0xff] %vm21_vm2, %v190_v21 }
 0x315   :  { %v189_v23 = vpop.xlane.xlu0 %188 }
 0x316   :  { %v191_v24 = vadd.f32 %v189_v23, %v169_v22 }
 0x318   :  { %194 = vst.msk [vmem:[#allocation3 + $0x8] sm:$0xff] %vm21_vm2, %v191_v24 }
 0x31b   :  { %v202_v25 = vld [vmem:[#allocation3] sm:$0xff] }
 0x31c   :  { %269 = vlog2.f32 %v202_v25 }
 0x31f   :  { %v203_v26 = vld [vmem:[#allocation3 + $0x8] sm:$0xff] }
 0x320   :  { %271 = vlog2.f32 %v203_v26 }
 0x329   :  { %v270_v27 = vpop.eup %269 }
 0x32a   :  { %v205_v28 = vmul.f32 0.6931472, %v270_v27 }
 0x32c   :  { %v208_v30 = vadd.f32 %v205_v28, %v200_v29 }
 0x32d   :  { %v272_v31 = vpop.eup %271 }
 0x32e   :  { %210 = vst.msk [vmem:[%s417_s4] sm:$0xff] %vm21_vm2, %v208_v30  ;;  %v207_v32 = vmul.f32 0.6931472, %v272_v31 }
 0x330   :  { %v209_v34 = vadd.f32 %v207_v32, %v201_v33 }
 0x332   :  { %211 = vst.msk [vmem:[%s417_s4 + $0x8] sm:$0xff] %vm21_vm2, %v209_v34 }

</bundles_post_ra>
